<compile_context>
chip_gen: v5e
topology: v5e:2x2
jax: 0.10.0
libtpu: 0.0.40
codegen_flags: <defaults>
</compile_context>

<pallas_src>
import jax
import jax.numpy as jnp
from jax.experimental import pallas as pl
from jax.experimental.pallas import tpu as pltpu


def lstm_tagger_kernel(ids_ref, embproj_ref, whh_ref, b_ref, wout_ref, bout_ref,
                       out_ref, gates_ref):
    T = ids_ref.shape[0]
    V = embproj_ref.shape[0]
    GP = whh_ref.shape[0]          # padded per-gate lane-group width == padded hidden width (128)

    # --- 1) Fused embedding lookup + input projection: one-hot(ids) @ emb_proj (one matmul,
    #        off the serial recurrence chain).  emb_proj = emb @ Wih^T, gate-padded. ---
    one_hot = (ids_ref[...] ==
               jax.lax.broadcasted_iota(jnp.int32, (T, V), 1)).astype(jnp.float32)   # (T, V)
    gates_x = (jnp.dot(one_hot, embproj_ref[...], preferred_element_type=jnp.float32)
               + b_ref[...])                                                          # (T, 4*GP)
    # Stage in VMEM so per-step reads are static-offset loads (load slot has slack),
    # not sublane extracts from a live vreg value on the recurrence critical path.
    gates_ref[...] = gates_x

    # --- 2) Recurrence, fully unrolled (T static & small). Whh hoisted: read ONCE, bf16. ---
    whh = whh_ref[...]                                   # (GP, 4*GP) bf16, reused every step
    h = jnp.zeros((1, GP), jnp.float32)
    c = jnp.zeros((1, GP), jnp.float32)
    hs = []
    for t in range(T):
        pre = (gates_ref[t:t + 1, :]
               + jnp.dot(h.astype(jnp.bfloat16), whh,
                         preferred_element_type=jnp.float32))                # (1, 4*GP) f32

        # Fused sigmoid over the contiguous [i|f|o] lane groups: one exp + one EXACT
        # reciprocal (approx error would compound through h/c over timesteps).
        sig = pl.reciprocal(1.0 + jnp.exp(-pre[:, 0:3 * GP]))
        i_g = sig[:, 0:GP]
        f_g = sig[:, GP:2 * GP]
        o_g = sig[:, 2 * GP:3 * GP]
        g_g = jnp.tanh(pre[:, 3 * GP:4 * GP])

        c = f_g * c + i_g * g_g          # padded lanes: 0.5*0 + 0.5*0 = 0
        h = o_g * jnp.tanh(c)            # padded lanes: 0.5*tanh(0)   = 0
        hs.append(h)

    h_all = jnp.concatenate(hs, axis=0)                                      # (T, GP) lane-dense

    # --- 3) hidden2tag + log_softmax on a lane-dense (T, 128) tile (f32 math).
    #        Padded tag lanes carry -1e30 bias so they contribute ~0 to the softmax sum. ---
    tag = (jnp.dot(h_all.astype(jnp.bfloat16), wout_ref[...],
                   preferred_element_type=jnp.float32)
           + bout_ref[...])                                                  # (T, TAG_PAD)
    m = jnp.max(tag, axis=-1, keepdims=True)
    lse = m + jnp.log(jnp.sum(jnp.exp(tag - m), axis=-1, keepdims=True))
    out_ref[...] = tag - lse


def lstm_tagger_forward(sentence, emb, w_ih, w_hh, b_ih, b_hh, w_out, b_out):
    """sentence: (T,) int32. Weights in PyTorch conventions:
       emb (V, E); w_ih (4H, E); w_hh (4H, H); b_ih/b_hh (4H,); w_out (tagset, H); b_out (tagset,)."""
    T = int(sentence.shape[0])
    H = int(w_hh.shape[1])
    tagset = int(w_out.shape[0])

    GP = 128        # each gate padded to one full lane group; also the padded hidden width
    TAG_PAD = 128   # lane-dense output width
    assert H <= GP and tagset <= TAG_PAD

    emb = jnp.asarray(emb, jnp.float32)
    w_ih = jnp.asarray(w_ih, jnp.float32)
    w_hh = jnp.asarray(w_hh, jnp.float32)
    b = (jnp.asarray(b_ih, jnp.float32) + jnp.asarray(b_hh, jnp.float32)).reshape(1, 4 * H)

    def regroup(w):
        # (rows, 4H) with PyTorch gate order [i,f,g,o] -> (rows, 4*GP) in order [i,f,o,g],
        # each gate ZERO-padded to a full 128-lane group.
        # NOTE: the zero padding here is load-bearing for correctness -- padded lanes of the
        # gate pre-activations must be exactly 0 so sigmoid->0.5 / tanh->0 and padded lanes
        # of c/h stay 0 (do NOT reuse the -1e30 trick used for the tag bias here).
        i, f, g, o = jnp.split(w, 4, axis=1)
        pad = lambda a: jnp.pad(a, ((0, 0), (0, GP - H)))
        return jnp.concatenate([pad(i), pad(f), pad(o), pad(g)], axis=1)

    # Fused embedding + input projection, precomputed once (f32; off the serial chain).
    emb_proj = regroup(emb @ w_ih.T)                                        # (V, 4*GP) f32
    b_p = regroup(b)                                                        # (1, 4*GP) f32

    # Recurrent weight: gate-padded, hidden rows zero-padded, bf16 for the MXU.
    whh_p = jnp.pad(regroup(w_hh.T), ((0, GP - H), (0, 0))).astype(jnp.bfloat16)   # (GP, 4*GP)

    wout_p = jnp.pad(jnp.asarray(w_out, jnp.float32).T,
                     ((0, GP - H), (0, TAG_PAD - tagset))).astype(jnp.bfloat16)    # (GP, TAG_PAD)
    # Keep the tag bias (and all log_softmax math) in f32: -1e30 underflows cleanly in f32
    # but would be -inf/NaN-prone in bf16.
    bout_p = jnp.pad(jnp.asarray(b_out, jnp.float32).reshape(1, tagset),
                     ((0, 0), (0, TAG_PAD - tagset)),
                     constant_values=-1e30)                                        # (1, TAG_PAD)

    ids = sentence.astype(jnp.int32).reshape(T, 1)

    out_padded = pl.pallas_call(
        lstm_tagger_kernel,
        out_shape=jax.ShapeDtypeStruct((T, TAG_PAD), jnp.float32),
        in_specs=[
            pl.BlockSpec(memory_space=pltpu.MemorySpace.VMEM),   # token ids (T, 1) int32
            pl.BlockSpec(memory_space=pltpu.MemorySpace.VMEM),   # emb_proj (V, 4*GP) f32
            pl.BlockSpec(memory_space=pltpu.MemorySpace.VMEM),   # Whh^T gate-padded (GP, 4*GP) bf16
            pl.BlockSpec(memory_space=pltpu.MemorySpace.VMEM),   # combined bias (1, 4*GP) f32
            pl.BlockSpec(memory_space=pltpu.MemorySpace.VMEM),   # Wout^T padded (GP, TAG_PAD) bf16
            pl.BlockSpec(memory_space=pltpu.MemorySpace.VMEM),   # bout padded (1, TAG_PAD) f32
        ],
        out_specs=pl.BlockSpec(memory_space=pltpu.MemorySpace.VMEM),
        scratch_shapes=[pltpu.VMEM((T, 4 * GP), jnp.float32)],   # staged gates_x
    )(ids, emb_proj, whh_p, b_p, wout_p, bout_p)

    return out_padded[:, :tagset]


def _reference_forward(sentence, emb, w_ih, w_hh, b_ih, b_hh, w_out, b_out):
    """Pure-JAX reference mirroring torch.nn.LSTM + Linear + log_softmax."""
    H = w_hh.shape[1]
    x = emb[sentence]                                       # (T, E)

    def cell(carry, x_t):
        h, c = carry
        gates = x_t @ w_ih.T + h @ w_hh.T + b_ih + b_hh
        i = jax.nn.sigmoid(gates[0:H])
        f = jax.nn.sigmoid(gates[H:2 * H])
        g = jnp.tanh(gates[2 * H:3 * H])
        o = jax.nn.sigmoid(gates[3 * H:4 * H])
        c_new = f * c + i * g
        h_new = o * jnp.tanh(c_new)
        return (h_new, c_new), h_new

    h0 = jnp.zeros((H,), jnp.float32)
    c0 = jnp.zeros((H,), jnp.float32)
    _, hs = jax.lax.scan(cell, (h0, c0), x)
    tag = hs @ w_out.T + b_out
    return jax.nn.log_softmax(tag, axis=1)


if __name__ == "__main__":
    # Small, deterministic configuration consistent with the module.
    EMBEDDING_DIM = 32
    HIDDEN_DIM = 32
    VOCAB_SIZE = 16
    TAGSET_SIZE = 8
    SEQ_LEN = 8

    key = jax.random.PRNGKey(0)
    keys = jax.random.split(key, 8)

    emb = jax.random.normal(keys[0], (VOCAB_SIZE, EMBEDDING_DIM), jnp.float32) * 0.1
    w_ih = jax.random.normal(keys[1], (4 * HIDDEN_DIM, EMBEDDING_DIM), jnp.float32) * 0.1
    w_hh = jax.random.normal(keys[2], (4 * HIDDEN_DIM, HIDDEN_DIM), jnp.float32) * 0.1
    b_ih = jax.random.normal(keys[3], (4 * HIDDEN_DIM,), jnp.float32) * 0.1
    b_hh = jax.random.normal(keys[4], (4 * HIDDEN_DIM,), jnp.float32) * 0.1
    w_out = jax.random.normal(keys[5], (TAGSET_SIZE, HIDDEN_DIM), jnp.float32) * 0.1
    b_out = jax.random.normal(keys[6], (TAGSET_SIZE,), jnp.float32) * 0.1

    sentence = jax.random.randint(keys[7], (SEQ_LEN,), 0, VOCAB_SIZE, jnp.int32)

    out = lstm_tagger_forward(sentence, emb, w_ih, w_hh, b_ih, b_hh, w_out, b_out)
    out = jax.block_until_ready(out)

    ref = _reference_forward(sentence, emb, w_ih, w_hh, b_ih, b_hh, w_out, b_out)
    ref = jax.block_until_ready(ref)

    assert out.shape == (SEQ_LEN, TAGSET_SIZE)
    assert bool(jnp.all(jnp.isfinite(out)))
    max_err = float(jnp.max(jnp.abs(out - ref)))
    assert max_err < 1e-2, f"mismatch vs reference: {max_err}"

    print("KERNEL_OK")
</pallas_src>

<mosaic_0001>
module attributes {stable_mosaic.version = 11 : i64} {
  func.func @lstm_tagger_kernel(%arg0: memref<8x1xi32, #tpu.memory_space<vmem>>, %arg1: memref<16x512xf32, #tpu.memory_space<vmem>>, %arg2: memref<128x512xbf16, #tpu.memory_space<vmem>>, %arg3: memref<1x512xf32, #tpu.memory_space<vmem>>, %arg4: memref<128x128xbf16, #tpu.memory_space<vmem>>, %arg5: memref<1x128xf32, #tpu.memory_space<vmem>>, %arg6: memref<8x128xf32, #tpu.memory_space<vmem>>, %arg7: memref<8x512xf32, #tpu.memory_space<vmem>>) attributes {dimension_semantics = [], scalar_prefetch = 0 : i64, scratch_operands = 1 : i64, tpu.core_type = #tpu.core_type<tc>} {
    %c0 = arith.constant 0 : index
    %c0_0 = arith.constant 0 : index
    %0 = vector.load %arg0[%c0, %c0_0] : memref<8x1xi32, #tpu.memory_space<vmem>>, vector<8x1xi32>
    %1 = tpu.iota {dimensions = array<i32: 1>} : vector<8x16xi32>
    %2 = vector.broadcast %0 : vector<8x1xi32> to vector<8x16xi32>
    %3 = arith.cmpi eq, %2, %1 : vector<8x16xi32>
    %4 = arith.extui %3 : vector<8x16xi1> to vector<8x16xi32>
    %5 = arith.sitofp %4 : vector<8x16xi32> to vector<8x16xf32>
    %c0_1 = arith.constant 0 : index
    %c0_2 = arith.constant 0 : index
    %6 = vector.load %arg1[%c0_1, %c0_2] : memref<16x512xf32, #tpu.memory_space<vmem>>, vector<16x512xf32>
    %cst = arith.constant dense<0.000000e+00> : vector<8x512xf32>
    %7 = tpu.matmul %5, %6, %cst {dimension_numbers = #tpu.dot_dimension_numbers<[1], [0], [0], [1], [0, 0, 1, 1], [], []>} : vector<8x16xf32>, vector<16x512xf32>, vector<8x512xf32> -> vector<8x512xf32>
    %c0_3 = arith.constant 0 : index
    %c0_4 = arith.constant 0 : index
    %8 = vector.load %arg3[%c0_3, %c0_4] : memref<1x512xf32, #tpu.memory_space<vmem>>, vector<1x512xf32>
    %9 = vector.broadcast %8 : vector<1x512xf32> to vector<8x512xf32>
    %10 = arith.addf %7, %9 : vector<8x512xf32>
    %c0_5 = arith.constant 0 : index
    %c0_6 = arith.constant 0 : index
    %11 = vector.load %arg7[%c0_5, %c0_6] : memref<8x512xf32, #tpu.memory_space<vmem>>, vector<8x512xf32>
    tpu.vector_store %arg7[%c0_5, %c0_6], %10 {strides = array<i32>} : memref<8x512xf32, #tpu.memory_space<vmem>>, vector<8x512xf32>,
    %c0_7 = arith.constant 0 : index
    %c0_8 = arith.constant 0 : index
    %12 = vector.load %arg2[%c0_7, %c0_8] : memref<128x512xbf16, #tpu.memory_space<vmem>>, vector<128x512xbf16>
    %cst_9 = arith.constant 0.000000e+00 : f32
    %13 = vector.broadcast %cst_9 : f32 to vector<1x128xf32>
    %cst_10 = arith.constant 0.000000e+00 : f32
    %14 = vector.broadcast %cst_10 : f32 to vector<1x128xf32>
    %c0_11 = arith.constant 0 : index
    %c0_12 = arith.constant 0 : index
    %15 = vector.load %arg7[%c0_11, %c0_12] : memref<8x512xf32, #tpu.memory_space<vmem>>, vector<1x512xf32>
    %16 = arith.truncf %13 : vector<1x128xf32> to vector<1x128xbf16>
    %cst_13 = arith.constant dense<0.000000e+00> : vector<1x512xf32>
    %17 = tpu.matmul %16, %12, %cst_13 {dimension_numbers = #tpu.dot_dimension_numbers<[1], [0], [0], [1], [0, 0, 1, 1], [], []>} : vector<1x128xbf16>, vector<128x512xbf16>, vector<1x512xf32> -> vector<1x512xf32>
    %18 = arith.addf %15, %17 : vector<1x512xf32>
    %19 = vector.extract_strided_slice %18 {offsets = [0, 0], sizes = [1, 384], strides = [1, 1]} : vector<1x512xf32> to vector<1x384xf32>
    %cst_14 = arith.constant 0.000000e+00 : f32
    %20 = vector.broadcast %cst_14 : f32 to vector<1x384xf32>
    %21 = arith.subf %20, %19 : vector<1x384xf32>
    %22 = math.exp %21 : vector<1x384xf32>
    %cst_15 = arith.constant 1.000000e+00 : f32
    %23 = vector.broadcast %cst_15 : f32 to vector<1x384xf32>
    %24 = arith.addf %23, %22 : vector<1x384xf32>
    %25 = tpu.reciprocal %24 : vector<1x384xf32> -> vector<1x384xf32>
    %26 = vector.extract_strided_slice %25 {offsets = [0, 0], sizes = [1, 128], strides = [1, 1]} : vector<1x384xf32> to vector<1x128xf32>
    %27 = vector.extract_strided_slice %25 {offsets = [0, 128], sizes = [1, 128], strides = [1, 1]} : vector<1x384xf32> to vector<1x128xf32>
    %28 = vector.extract_strided_slice %25 {offsets = [0, 256], sizes = [1, 128], strides = [1, 1]} : vector<1x384xf32> to vector<1x128xf32>
    %29 = vector.extract_strided_slice %18 {offsets = [0, 384], sizes = [1, 128], strides = [1, 1]} : vector<1x512xf32> to vector<1x128xf32>
    %30 = math.tanh %29 : vector<1x128xf32>
    %31 = arith.mulf %27, %14 : vector<1x128xf32>
    %32 = arith.mulf %26, %30 : vector<1x128xf32>
    %33 = arith.addf %31, %32 : vector<1x128xf32>
    %34 = math.tanh %33 : vector<1x128xf32>
    %35 = arith.mulf %28, %34 : vector<1x128xf32>
    %c1 = arith.constant 1 : index
    %c0_16 = arith.constant 0 : index
    %36 = vector.load %arg7[%c1, %c0_16] : memref<8x512xf32, #tpu.memory_space<vmem>>, vector<1x512xf32>
    %37 = arith.truncf %35 : vector<1x128xf32> to vector<1x128xbf16>
    %cst_17 = arith.constant dense<0.000000e+00> : vector<1x512xf32>
    %38 = tpu.matmul %37, %12, %cst_17 {dimension_numbers = #tpu.dot_dimension_numbers<[1], [0], [0], [1], [0, 0, 1, 1], [], []>} : vector<1x128xbf16>, vector<128x512xbf16>, vector<1x512xf32> -> vector<1x512xf32>
    %39 = arith.addf %36, %38 : vector<1x512xf32>
    %40 = vector.extract_strided_slice %39 {offsets = [0, 0], sizes = [1, 384], strides = [1, 1]} : vector<1x512xf32> to vector<1x384xf32>
    %cst_18 = arith.constant 0.000000e+00 : f32
    %41 = vector.broadcast %cst_18 : f32 to vector<1x384xf32>
    %42 = arith.subf %41, %40 : vector<1x384xf32>
    %43 = math.exp %42 : vector<1x384xf32>
    %cst_19 = arith.constant 1.000000e+00 : f32
    %44 = vector.broadcast %cst_19 : f32 to vector<1x384xf32>
    %45 = arith.addf %44, %43 : vector<1x384xf32>
    %46 = tpu.reciprocal %45 : vector<1x384xf32> -> vector<1x384xf32>
    %47 = vector.extract_strided_slice %46 {offsets = [0, 0], sizes = [1, 128], strides = [1, 1]} : vector<1x384xf32> to vector<1x128xf32>
    %48 = vector.extract_strided_slice %46 {offsets = [0, 128], sizes = [1, 128], strides = [1, 1]} : vector<1x384xf32> to vector<1x128xf32>
    %49 = vector.extract_strided_slice %46 {offsets = [0, 256], sizes = [1, 128], strides = [1, 1]} : vector<1x384xf32> to vector<1x128xf32>
    %50 = vector.extract_strided_slice %39 {offsets = [0, 384], sizes = [1, 128], strides = [1, 1]} : vector<1x512xf32> to vector<1x128xf32>
    %51 = math.tanh %50 : vector<1x128xf32>
    %52 = arith.mulf %48, %33 : vector<1x128xf32>
    %53 = arith.mulf %47, %51 : vector<1x128xf32>
    %54 = arith.addf %52, %53 : vector<1x128xf32>
    %55 = math.tanh %54 : vector<1x128xf32>
    %56 = arith.mulf %49, %55 : vector<1x128xf32>
    %c2 = arith.constant 2 : index
    %c0_20 = arith.constant 0 : index
    %57 = vector.load %arg7[%c2, %c0_20] : memref<8x512xf32, #tpu.memory_space<vmem>>, vector<1x512xf32>
    %58 = arith.truncf %56 : vector<1x128xf32> to vector<1x128xbf16>
    %cst_21 = arith.constant dense<0.000000e+00> : vector<1x512xf32>
    %59 = tpu.matmul %58, %12, %cst_21 {dimension_numbers = #tpu.dot_dimension_numbers<[1], [0], [0], [1], [0, 0, 1, 1], [], []>} : vector<1x128xbf16>, vector<128x512xbf16>, vector<1x512xf32> -> vector<1x512xf32>
    %60 = arith.addf %57, %59 : vector<1x512xf32>
    %61 = vector.extract_strided_slice %60 {offsets = [0, 0], sizes = [1, 384], strides = [1, 1]} : vector<1x512xf32> to vector<1x384xf32>
    %cst_22 = arith.constant 0.000000e+00 : f32
    %62 = vector.broadcast %cst_22 : f32 to vector<1x384xf32>
    %63 = arith.subf %62, %61 : vector<1x384xf32>
    %64 = math.exp %63 : vector<1x384xf32>
    %cst_23 = arith.constant 1.000000e+00 : f32
    %65 = vector.broadcast %cst_23 : f32 to vector<1x384xf32>
    %66 = arith.addf %65, %64 : vector<1x384xf32>
    %67 = tpu.reciprocal %66 : vector<1x384xf32> -> vector<1x384xf32>
    %68 = vector.extract_strided_slice %67 {offsets = [0, 0], sizes = [1, 128], strides = [1, 1]} : vector<1x384xf32> to vector<1x128xf32>
    %69 = vector.extract_strided_slice %67 {offsets = [0, 128], sizes = [1, 128], strides = [1, 1]} : vector<1x384xf32> to vector<1x128xf32>
    %70 = vector.extract_strided_slice %67 {offsets = [0, 256], sizes = [1, 128], strides = [1, 1]} : vector<1x384xf32> to vector<1x128xf32>
    %71 = vector.extract_strided_slice %60 {offsets = [0, 384], sizes = [1, 128], strides = [1, 1]} : vector<1x512xf32> to vector<1x128xf32>
    %72 = math.tanh %71 : vector<1x128xf32>
    %73 = arith.mulf %69, %54 : vector<1x128xf32>
    %74 = arith.mulf %68, %72 : vector<1x128xf32>
    %75 = arith.addf %73, %74 : vector<1x128xf32>
    %76 = math.tanh %75 : vector<1x128xf32>
    %77 = arith.mulf %70, %76 : vector<1x128xf32>
    %c3 = arith.constant 3 : index
    %c0_24 = arith.constant 0 : index
    %78 = vector.load %arg7[%c3, %c0_24] : memref<8x512xf32, #tpu.memory_space<vmem>>, vector<1x512xf32>
    %79 = arith.truncf %77 : vector<1x128xf32> to vector<1x128xbf16>
    %cst_25 = arith.constant dense<0.000000e+00> : vector<1x512xf32>
    %80 = tpu.matmul %79, %12, %cst_25 {dimension_numbers = #tpu.dot_dimension_numbers<[1], [0], [0], [1], [0, 0, 1, 1], [], []>} : vector<1x128xbf16>, vector<128x512xbf16>, vector<1x512xf32> -> vector<1x512xf32>
    %81 = arith.addf %78, %80 : vector<1x512xf32>
    %82 = vector.extract_strided_slice %81 {offsets = [0, 0], sizes = [1, 384], strides = [1, 1]} : vector<1x512xf32> to vector<1x384xf32>
    %cst_26 = arith.constant 0.000000e+00 : f32
    %83 = vector.broadcast %cst_26 : f32 to vector<1x384xf32>
    %84 = arith.subf %83, %82 : vector<1x384xf32>
    %85 = math.exp %84 : vector<1x384xf32>
    %cst_27 = arith.constant 1.000000e+00 : f32
    %86 = vector.broadcast %cst_27 : f32 to vector<1x384xf32>
    %87 = arith.addf %86, %85 : vector<1x384xf32>
    %88 = tpu.reciprocal %87 : vector<1x384xf32> -> vector<1x384xf32>
    %89 = vector.extract_strided_slice %88 {offsets = [0, 0], sizes = [1, 128], strides = [1, 1]} : vector<1x384xf32> to vector<1x128xf32>
    %90 = vector.extract_strided_slice %88 {offsets = [0, 128], sizes = [1, 128], strides = [1, 1]} : vector<1x384xf32> to vector<1x128xf32>
    %91 = vector.extract_strided_slice %88 {offsets = [0, 256], sizes = [1, 128], strides = [1, 1]} : vector<1x384xf32> to vector<1x128xf32>
    %92 = vector.extract_strided_slice %81 {offsets = [0, 384], sizes = [1, 128], strides = [1, 1]} : vector<1x512xf32> to vector<1x128xf32>
    %93 = math.tanh %92 : vector<1x128xf32>
    %94 = arith.mulf %90, %75 : vector<1x128xf32>
    %95 = arith.mulf %89, %93 : vector<1x128xf32>
    %96 = arith.addf %94, %95 : vector<1x128xf32>
    %97 = math.tanh %96 : vector<1x128xf32>
    %98 = arith.mulf %91, %97 : vector<1x128xf32>
    %c4 = arith.constant 4 : index
    %c0_28 = arith.constant 0 : index
    %99 = vector.load %arg7[%c4, %c0_28] : memref<8x512xf32, #tpu.memory_space<vmem>>, vector<1x512xf32>
    %100 = arith.truncf %98 : vector<1x128xf32> to vector<1x128xbf16>
    %cst_29 = arith.constant dense<0.000000e+00> : vector<1x512xf32>
    %101 = tpu.matmul %100, %12, %cst_29 {dimension_numbers = #tpu.dot_dimension_numbers<[1], [0], [0], [1], [0, 0, 1, 1], [], []>} : vector<1x128xbf16>, vector<128x512xbf16>, vector<1x512xf32> -> vector<1x512xf32>
    %102 = arith.addf %99, %101 : vector<1x512xf32>
    %103 = vector.extract_strided_slice %102 {offsets = [0, 0], sizes = [1, 384], strides = [1, 1]} : vector<1x512xf32> to vector<1x384xf32>
    %cst_30 = arith.constant 0.000000e+00 : f32
    %104 = vector.broadcast %cst_30 : f32 to vector<1x384xf32>
    %105 = arith.subf %104, %103 : vector<1x384xf32>
    %106 = math.exp %105 : vector<1x384xf32>
    %cst_31 = arith.constant 1.000000e+00 : f32
    %107 = vector.broadcast %cst_31 : f32 to vector<1x384xf32>
    %108 = arith.addf %107, %106 : vector<1x384xf32>
    %109 = tpu.reciprocal %108 : vector<1x384xf32> -> vector<1x384xf32>
    %110 = vector.extract_strided_slice %109 {offsets = [0, 0], sizes = [1, 128], strides = [1, 1]} : vector<1x384xf32> to vector<1x128xf32>
    %111 = vector.extract_strided_slice %109 {offsets = [0, 128], sizes = [1, 128], strides = [1, 1]} : vector<1x384xf32> to vector<1x128xf32>
    %112 = vector.extract_strided_slice %109 {offsets = [0, 256], sizes = [1, 128], strides = [1, 1]} : vector<1x384xf32> to vector<1x128xf32>
    %113 = vector.extract_strided_slice %102 {offsets = [0, 384], sizes = [1, 128], strides = [1, 1]} : vector<1x512xf32> to vector<1x128xf32>
    %114 = math.tanh %113 : vector<1x128xf32>
    %115 = arith.mulf %111, %96 : vector<1x128xf32>
    %116 = arith.mulf %110, %114 : vector<1x128xf32>
    %117 = arith.addf %115, %116 : vector<1x128xf32>
    %118 = math.tanh %117 : vector<1x128xf32>
    %119 = arith.mulf %112, %118 : vector<1x128xf32>
    %c5 = arith.constant 5 : index
    %c0_32 = arith.constant 0 : index
    %120 = vector.load %arg7[%c5, %c0_32] : memref<8x512xf32, #tpu.memory_space<vmem>>, vector<1x512xf32>
    %121 = arith.truncf %119 : vector<1x128xf32> to vector<1x128xbf16>
    %cst_33 = arith.constant dense<0.000000e+00> : vector<1x512xf32>
    %122 = tpu.matmul %121, %12, %cst_33 {dimension_numbers = #tpu.dot_dimension_numbers<[1], [0], [0], [1], [0, 0, 1, 1], [], []>} : vector<1x128xbf16>, vector<128x512xbf16>, vector<1x512xf32> -> vector<1x512xf32>
    %123 = arith.addf %120, %122 : vector<1x512xf32>
    %124 = vector.extract_strided_slice %123 {offsets = [0, 0], sizes = [1, 384], strides = [1, 1]} : vector<1x512xf32> to vector<1x384xf32>
    %cst_34 = arith.constant 0.000000e+00 : f32
    %125 = vector.broadcast %cst_34 : f32 to vector<1x384xf32>
    %126 = arith.subf %125, %124 : vector<1x384xf32>
    %127 = math.exp %126 : vector<1x384xf32>
    %cst_35 = arith.constant 1.000000e+00 : f32
    %128 = vector.broadcast %cst_35 : f32 to vector<1x384xf32>
    %129 = arith.addf %128, %127 : vector<1x384xf32>
    %130 = tpu.reciprocal %129 : vector<1x384xf32> -> vector<1x384xf32>
    %131 = vector.extract_strided_slice %130 {offsets = [0, 0], sizes = [1, 128], strides = [1, 1]} : vector<1x384xf32> to vector<1x128xf32>
    %132 = vector.extract_strided_slice %130 {offsets = [0, 128], sizes = [1, 128], strides = [1, 1]} : vector<1x384xf32> to vector<1x128xf32>
    %133 = vector.extract_strided_slice %130 {offsets = [0, 256], sizes = [1, 128], strides = [1, 1]} : vector<1x384xf32> to vector<1x128xf32>
    %134 = vector.extract_strided_slice %123 {offsets = [0, 384], sizes = [1, 128], strides = [1, 1]} : vector<1x512xf32> to vector<1x128xf32>
    %135 = math.tanh %134 : vector<1x128xf32>
    %136 = arith.mulf %132, %117 : vector<1x128xf32>
    %137 = arith.mulf %131, %135 : vector<1x128xf32>
    %138 = arith.addf %136, %137 : vector<1x128xf32>
    %139 = math.tanh %138 : vector<1x128xf32>
    %140 = arith.mulf %133, %139 : vector<1x128xf32>
    %c6 = arith.constant 6 : index
    %c0_36 = arith.constant 0 : index
    %141 = vector.load %arg7[%c6, %c0_36] : memref<8x512xf32, #tpu.memory_space<vmem>>, vector<1x512xf32>
    %142 = arith.truncf %140 : vector<1x128xf32> to vector<1x128xbf16>
    %cst_37 = arith.constant dense<0.000000e+00> : vector<1x512xf32>
    %143 = tpu.matmul %142, %12, %cst_37 {dimension_numbers = #tpu.dot_dimension_numbers<[1], [0], [0], [1], [0, 0, 1, 1], [], []>} : vector<1x128xbf16>, vector<128x512xbf16>, vector<1x512xf32> -> vector<1x512xf32>
    %144 = arith.addf %141, %143 : vector<1x512xf32>
    %145 = vector.extract_strided_slice %144 {offsets = [0, 0], sizes = [1, 384], strides = [1, 1]} : vector<1x512xf32> to vector<1x384xf32>
    %cst_38 = arith.constant 0.000000e+00 : f32
    %146 = vector.broadcast %cst_38 : f32 to vector<1x384xf32>
    %147 = arith.subf %146, %145 : vector<1x384xf32>
    %148 = math.exp %147 : vector<1x384xf32>
    %cst_39 = arith.constant 1.000000e+00 : f32
    %149 = vector.broadcast %cst_39 : f32 to vector<1x384xf32>
    %150 = arith.addf %149, %148 : vector<1x384xf32>
    %151 = tpu.reciprocal %150 : vector<1x384xf32> -> vector<1x384xf32>
    %152 = vector.extract_strided_slice %151 {offsets = [0, 0], sizes = [1, 128], strides = [1, 1]} : vector<1x384xf32> to vector<1x128xf32>
    %153 = vector.extract_strided_slice %151 {offsets = [0, 128], sizes = [1, 128], strides = [1, 1]} : vector<1x384xf32> to vector<1x128xf32>
    %154 = vector.extract_strided_slice %151 {offsets = [0, 256], sizes = [1, 128], strides = [1, 1]} : vector<1x384xf32> to vector<1x128xf32>
    %155 = vector.extract_strided_slice %144 {offsets = [0, 384], sizes = [1, 128], strides = [1, 1]} : vector<1x512xf32> to vector<1x128xf32>
    %156 = math.tanh %155 : vector<1x128xf32>
    %157 = arith.mulf %153, %138 : vector<1x128xf32>
    %158 = arith.mulf %152, %156 : vector<1x128xf32>
    %159 = arith.addf %157, %158 : vector<1x128xf32>
    %160 = math.tanh %159 : vector<1x128xf32>
    %161 = arith.mulf %154, %160 : vector<1x128xf32>
    %c7 = arith.constant 7 : index
    %c0_40 = arith.constant 0 : index
    %162 = vector.load %arg7[%c7, %c0_40] : memref<8x512xf32, #tpu.memory_space<vmem>>, vector<1x512xf32>
    %163 = arith.truncf %161 : vector<1x128xf32> to vector<1x128xbf16>
    %cst_41 = arith.constant dense<0.000000e+00> : vector<1x512xf32>
    %164 = tpu.matmul %163, %12, %cst_41 {dimension_numbers = #tpu.dot_dimension_numbers<[1], [0], [0], [1], [0, 0, 1, 1], [], []>} : vector<1x128xbf16>, vector<128x512xbf16>, vector<1x512xf32> -> vector<1x512xf32>
    %165 = arith.addf %162, %164 : vector<1x512xf32>
    %166 = vector.extract_strided_slice %165 {offsets = [0, 0], sizes = [1, 384], strides = [1, 1]} : vector<1x512xf32> to vector<1x384xf32>
    %cst_42 = arith.constant 0.000000e+00 : f32
    %167 = vector.broadcast %cst_42 : f32 to vector<1x384xf32>
    %168 = arith.subf %167, %166 : vector<1x384xf32>
    %169 = math.exp %168 : vector<1x384xf32>
    %cst_43 = arith.constant 1.000000e+00 : f32
    %170 = vector.broadcast %cst_43 : f32 to vector<1x384xf32>
    %171 = arith.addf %170, %169 : vector<1x384xf32>
    %172 = tpu.reciprocal %171 : vector<1x384xf32> -> vector<1x384xf32>
    %173 = vector.extract_strided_slice %172 {offsets = [0, 0], sizes = [1, 128], strides = [1, 1]} : vector<1x384xf32> to vector<1x128xf32>
    %174 = vector.extract_strided_slice %172 {offsets = [0, 128], sizes = [1, 128], strides = [1, 1]} : vector<1x384xf32> to vector<1x128xf32>
    %175 = vector.extract_strided_slice %172 {offsets = [0, 256], sizes = [1, 128], strides = [1, 1]} : vector<1x384xf32> to vector<1x128xf32>
    %176 = vector.extract_strided_slice %165 {offsets = [0, 384], sizes = [1, 128], strides = [1, 1]} : vector<1x512xf32> to vector<1x128xf32>
    %177 = math.tanh %176 : vector<1x128xf32>
    %178 = arith.mulf %174, %159 : vector<1x128xf32>
    %179 = arith.mulf %173, %177 : vector<1x128xf32>
    %180 = arith.addf %178, %179 : vector<1x128xf32>
    %181 = math.tanh %180 : vector<1x128xf32>
    %182 = arith.mulf %175, %181 : vector<1x128xf32>
    %183 = tpu.concatenate %35, %56, %77, %98, %119, %140, %161, %182 in 0 : vector<1x128xf32>, vector<1x128xf32>, vector<1x128xf32>, vector<1x128xf32>, vector<1x128xf32>, vector<1x128xf32>, vector<1x128xf32>, vector<1x128xf32> -> vector<8x128xf32>
    %184 = arith.truncf %183 : vector<8x128xf32> to vector<8x128xbf16>
    %c0_44 = arith.constant 0 : index
    %c0_45 = arith.constant 0 : index
    %185 = vector.load %arg4[%c0_44, %c0_45] : memref<128x128xbf16, #tpu.memory_space<vmem>>, vector<128x128xbf16>
    %cst_46 = arith.constant dense<0.000000e+00> : vector<8x128xf32>
    %186 = tpu.matmul %184, %185, %cst_46 {dimension_numbers = #tpu.dot_dimension_numbers<[1], [0], [0], [1], [0, 0, 1, 1], [], []>} : vector<8x128xbf16>, vector<128x128xbf16>, vector<8x128xf32> -> vector<8x128xf32>
    %c0_47 = arith.constant 0 : index
    %c0_48 = arith.constant 0 : index
    %187 = vector.load %arg5[%c0_47, %c0_48] : memref<1x128xf32, #tpu.memory_space<vmem>>, vector<1x128xf32>
    %188 = vector.broadcast %187 : vector<1x128xf32> to vector<8x128xf32>
    %189 = arith.addf %186, %188 : vector<8x128xf32>
    %cst_49 = arith.constant dense<0xFF800000> : vector<8xf32>
    %190 = vector.multi_reduction <maximumf>, %189, %cst_49 [1] : vector<8x128xf32> to vector<8xf32>
    %191 = vector.shape_cast %190 : vector<8xf32> to vector<8x1xf32>
    %192 = vector.broadcast %191 : vector<8x1xf32> to vector<8x128xf32>
    %193 = arith.subf %189, %192 : vector<8x128xf32>
    %194 = math.exp %193 : vector<8x128xf32>
    %cst_50 = arith.constant dense<0.000000e+00> : vector<8xf32>
    %195 = vector.multi_reduction <add>, %194, %cst_50 [1] : vector<8x128xf32> to vector<8xf32>
    %196 = vector.shape_cast %195 : vector<8xf32> to vector<8x1xf32>
    %197 = math.log %196 : vector<8x1xf32>
    %198 = arith.addf %191, %197 : vector<8x1xf32>
    %199 = vector.broadcast %198 : vector<8x1xf32> to vector<8x128xf32>
    %200 = arith.subf %189, %199 : vector<8x128xf32>
    %c0_51 = arith.constant 0 : index
    %c0_52 = arith.constant 0 : index
    %201 = vector.load %arg6[%c0_51, %c0_52] : memref<8x128xf32, #tpu.memory_space<vmem>>, vector<8x128xf32>
    tpu.vector_store %arg6[%c0_51, %c0_52], %200 {strides = array<i32>} : memref<8x128xf32, #tpu.memory_space<vmem>>, vector<8x128xf32>,
    return
  }
}

</mosaic_0001>

<bundles_post_ra>
// kernel: tpu_custom_call.1
= control target key start
LH: loop header
LB: loop body
LE: loop exit
PB: predicated region body
PF: predicated region fallthrough
CT: control target
= control target key end

     0   :  { %11 = vsyncpa [#allocation4], 0  ;;  %s2175_s0 = inlined_call_operand.vmem [shape: s32[8,1], index: 0, kind: input, shape index: {}]   ;;  %s2176_s1 = inlined_call_operand.hbm [shape: f32[16,512], index: 1, kind: input, shape index: {}]   ;;  %s2177_s2 = inlined_call_operand.hbm [shape: bf16[128,512], index: 2, kind: input, shape index: {}]   ;;  %s2178_s3 = inlined_call_operand.vmem [shape: f32[1,512], index: 3, kind: input, shape index: {}]   ;;  %s2179_s4 = inlined_call_operand.hbm [shape: bf16[128,128], index: 4, kind: input, shape index: {}]   ;;  %s2180_s5 = inlined_call_operand.vmem [shape: f32[1,128], index: 5, kind: input, shape index: {}]   ;;  %s2181_s6 = inlined_call_operand.hbm [shape: f32[8,128], index: 6, kind: output, shape index: {}]  }
   0x1   :  { %12 = vsyncpa [#allocation7], 0  ;;  %s33_s23 = sshll.u32 %s2177_s2, 4  ;;  %s34_s23 = int_to_ptr.hbm [resolvable:$true] %s33_s23 }
   0x2   :  { %13 = vsyncpa [#allocation5], 0  ;;  %s1706_s24 = smov [#allocation6]   ;;  %s20_s28 = sshll.u32 %s2176_s1, 4  ;;  %s21_s28 = int_to_ptr.hbm [resolvable:$true] %s20_s28 }
   0x3   :  { %s35_s25 = sshll.u32 %s1706_s24, 4  ;;  %s1707_s29 = smov 256   ;;  %s36_s25 = int_to_ptr.vmem [resolvable:$true] %s35_s25 }
   0x4   :  { %s1708_s30 = smov 16   ;;  %s1709_s7 = smov [#allocation3]  }
   0x5   :  { %41 = dma.hbm_to_vmem [thread:$0]  %s34_s23, 4096, %s36_s25, [#allocation7], %s1707_s29, %s1707_s29, %s1708_s30  }
   0x6   :  { %s22_s8 = sshll.u32 %s1709_s7, 4  ;;  %s1710_s9 = smov 512   ;;  %s23_s8 = int_to_ptr.vmem [resolvable:$true] %s22_s8 }
   0x7   :  { %s1711_s10 = smov 32   ;;  %s48_s12 = sshll.u32 %s2179_s4, 4  ;;  %s49_s12 = int_to_ptr.hbm [resolvable:$true] %s48_s12 }
   0x8   :  { %28 = dma.hbm_to_vmem [thread:$0]  %s21_s28, 1024, %s23_s8, [#allocation4], %s1710_s9, %s1710_s9, %s1711_s10  }
   0x9   :  { %s1712_s13 = smov [#allocation8]   ;;  %s1713_s15 = smov 64  }
   0xa   :  { %s50_s14 = sshll.u32 %s1712_s13, 4  ;;  %s1714_s1 = smov 4   ;;  %s51_s14 = int_to_ptr.vmem [resolvable:$true] %s50_s14 }
   0xb   :  { %56 = dma.hbm_to_vmem [thread:$0]  %s49_s12, 1024, %s51_s14, [#allocation7], %s1713_s15, %s1713_s15, %s1714_s1  }
   0xc   :  { %1700 = dma.done.wait [#allocation4], 1024  }
   0xd   :  { %1701 = vsyncadd [#allocation4], 4294966272 }
   0xe   :  { %1702 = dma.done.wait [#allocation7], 5120  }
   0xf   :  { %1703 = vsyncadd [#allocation7], 4294962176  ;;  %v1715_v0 = vmov 0   ;;  %v72_v1 = vld [vmem:[%s2175_s0] sm:$0xff]  ;;  %v87_v2 = vld [vmem:[#allocation3 + $0x30] sm:$0xff]  ;;  %vm99_vm0 = vcmask 130048  }
  0x10   :  { %1534 = vset.pattern.permute.xlu0 %v1715_v0  ;;  %v88_v3 = vld [vmem:[#allocation3 + $0x38] sm:$0xff]  ;;  %157 = vmatpush.msra.mxu2 %v87_v2  ;;  %v83_v4 = vld [vmem:[#allocation3 + $0x10] sm:$0xff]  ;;  %v1444_v6 = vld [vmem:[#allocation6 + $0xe8] sm:$0xf]  ;;  %vm441_vm2 = vcmask 1042434   ;;  %vm439_vm3 = vcmask 1040384  }
  0x11   :  { %76 = vperm.xlu0 %1534, %v72_v1   ;;  %v84_v5 = vld [vmem:[#allocation3 + $0x18] sm:$0xff]  ;;  %177 = vmatpush.msra.mxu3 %v88_v3  ;;  %v1511_v8 = vld [vmem:[#allocation6 + $0xec] sm:$0xf]  ;;  %v1428_v12 = vld [vmem:[#allocation6 + $0xc8] sm:$0xf]  ;;  %vm443_vm4 = vcmask 1041408  }
  0x12   :  { %v1513_v7 = vld [vmem:[#allocation6 + $0xf4] sm:$0xf0]  ;;  %v1446_v9 = vld [vmem:[#allocation6 + $0xf8] sm:$0xf0]  ;;  %158 = vmatpush.msra.mxu2 %v83_v4  ;;  %v1507_v14 = vld [vmem:[#allocation6 + $0xcc] sm:$0xf] }
  0x13   :  { %v1766_v10 = vor.u32 %v1513_v7, %v1444_v6  ;;  %v1768_v11 = vor.u32 %v1511_v8, %v1446_v9  ;;  %v1509_v13 = vld [vmem:[#allocation6 + $0xd4] sm:$0xf0]  ;;  %178 = vmatpush.msra.mxu3 %v84_v5  ;;  %v1430_v15 = vld [vmem:[#allocation6 + $0xd8] sm:$0xf0]  ;;  %v85_v16 = vld [vmem:[#allocation3 + $0x20] sm:$0xff]  ;;  %s1717_s19 = smov [#allocation9]  }
  0x14   :  { %v1436_v17 = vld [vmem:[#allocation6 + $0xe0] sm:$0xf]  ;;  %v1772_v18 = vor.u32 %v1509_v13, %v1428_v12  ;;  %v1774_v19 = vor.u32 %v1507_v14, %v1430_v15  ;;  %v1512_v20 = vld [vmem:[#allocation6 + $0xec] sm:$0xf0]  ;;  %v1412_v21 = vld [vmem:[#allocation6 + $0xa8] sm:$0xf]  ;;  %117 = vmatpush.msra.mxu1 %v85_v16 }
  0x15   :  { %406 = vmatpush.bf16.msrb.mxu2 %v1766_v10  ;;  %419 = vmatpush.bf16.msrb.mxu3 %v1768_v11  ;;  %v1505_v22 = vld [vmem:[#allocation6 + $0xb4] sm:$0xf0]  ;;  %v1776_v23 = vor.u32 %v1512_v20, %v1436_v17  ;;  %v1503_v24 = vld [vmem:[#allocation6 + $0xac] sm:$0xf]  ;;  %v1414_v25 = vld [vmem:[#allocation6 + $0xb8] sm:$0xf0] }
  0x16   :  { %v81_v26 = vld [vmem:[#allocation3] sm:$0xff]  ;;  %v86_v27 = vld [vmem:[#allocation3 + $0x28] sm:$0xff]  ;;  %v1781_v28 = vor.u32 %v1505_v22, %v1412_v21  ;;  %v1783_v29 = vor.u32 %v1503_v24, %v1414_v25  ;;  %v1508_v31 = vld [vmem:[#allocation6 + $0xcc] sm:$0xf0]  ;;  %v73_v24 = vlaneseq  ;;  %s1304_s20 = sshll.u32 %s1717_s19, 4  ;;  %s1305_s20 = int_to_ptr.vmem [resolvable:$true] %s1304_s20 }
  0x17   :  { %380 = vmatpush.bf16.msra.mxu0 %v1776_v23  ;;  %118 = vmatpush.msra.mxu1 %v81_v26  ;;  %v1420_v30 = vld [vmem:[#allocation6 + $0xc0] sm:$0xf]  ;;  %v1396_v32 = vld [vmem:[#allocation6 + $0x88] sm:$0xf]  ;;  %v1501_v34 = vld [vmem:[#allocation6 + $0x94] sm:$0xf0] }
  0x18   :  { %v1787_v33 = vor.u32 %v1508_v31, %v1420_v30  ;;  %v1499_v35 = vld [vmem:[#allocation6 + $0x8c] sm:$0xf]  ;;  %v1398_v36 = vld [vmem:[#allocation6 + $0x98] sm:$0xf0]  ;;  %v1789_v37 = vor.u32 %v1501_v34, %v1396_v32  ;;  %v1404_v40 = vld [vmem:[#allocation6 + $0xa0] sm:$0xf] }
  0x19   :  { %407 = vmatpush.bf16.msrb.mxu2 %v1772_v18  ;;  %420 = vmatpush.bf16.msrb.mxu3 %v1774_v19  ;;  %v1791_v38 = vor.u32 %v1499_v35, %v1398_v36  ;;  %v82_v39 = vld [vmem:[#allocation3 + $0x8] sm:$0xff]  ;;  %v1504_v41 = vld [vmem:[#allocation6 + $0xac] sm:$0xf0]  ;;  %v1497_v44 = vld [vmem:[#allocation6 + $0x74] sm:$0xf0]  ;;  %v74_v25 = vand.u32 127, %v73_v24 }
  0x1a   :  { %137 = vmatpush.msrb.mxu1 %v86_v27  ;;  %v1380_v42 = vld [vmem:[#allocation6 + $0x68] sm:$0xf]  ;;  %v1796_v43 = vor.u32 %v1504_v41, %v1404_v40  ;;  %v1495_v45 = vld [vmem:[#allocation6 + $0x6c] sm:$0xf]  ;;  %v1382_v46 = vld [vmem:[#allocation6 + $0x78] sm:$0xf0] }
  0x1b   :  { %381 = vmatpush.bf16.msra.mxu0 %v1787_v33  ;;  %v1798_v47 = vor.u32 %v1497_v44, %v1380_v42  ;;  %v1800_v48 = vor.u32 %v1495_v45, %v1382_v46  ;;  %v1388_v49 = vld [vmem:[#allocation6 + $0x80] sm:$0xf]  ;;  %v1500_v50 = vld [vmem:[#allocation6 + $0x8c] sm:$0xf0]  ;;  %v1364_v51 = vld [vmem:[#allocation6 + $0x48] sm:$0xf] }
  0x1c   :  { %138 = vmatpush.msrb.mxu1 %v82_v39  ;;  %v1805_v52 = vor.u32 %v1500_v50, %v1388_v49  ;;  %v1493_v53 = vld [vmem:[#allocation6 + $0x54] sm:$0xf0]  ;;  %v1491_v54 = vld [vmem:[#allocation6 + $0x4c] sm:$0xf]  ;;  %v1366_v55 = vld [vmem:[#allocation6 + $0x58] sm:$0xf0] }
  0x1d   :  { %408 = vmatpush.bf16.msrb.mxu2 %v1781_v28  ;;  %421 = vmatpush.bf16.msrb.mxu3 %v1783_v29  ;;  %v1807_v56 = vor.u32 %v1493_v53, %v1364_v51  ;;  %v1809_v57 = vor.u32 %v1491_v54, %v1366_v55  ;;  %v1372_v58 = vld [vmem:[#allocation6 + $0x60] sm:$0xf]  ;;  %v1496_v59 = vld [vmem:[#allocation6 + $0x6c] sm:$0xf0]  ;;  %v1348_v60 = vld [vmem:[#allocation6 + $0x28] sm:$0xf] }
  0x1e   :  { %v1814_v61 = vor.u32 %v1496_v59, %v1372_v58  ;;  %v1489_v62 = vld [vmem:[#allocation6 + $0x34] sm:$0xf0]  ;;  %v1487_v63 = vld [vmem:[#allocation6 + $0x2c] sm:$0xf]  ;;  %v1350_v1 = vld [vmem:[#allocation6 + $0x38] sm:$0xf0] }
  0x1f   :  { %382 = vmatpush.bf16.msra.mxu0 %v1796_v43  ;;  %v1816_v2 = vor.u32 %v1489_v62, %v1348_v60  ;;  %v1818_v3 = vor.u32 %v1487_v63, %v1350_v1  ;;  %v1356_v4 = vld [vmem:[#allocation6 + $0x40] sm:$0xf]  ;;  %v1492_v5 = vld [vmem:[#allocation6 + $0x4c] sm:$0xf0]  ;;  %v1332_v6 = vld [vmem:[#allocation6 + $0x8] sm:$0xf] }
  0x20   :  { %v1823_v7 = vor.u32 %v1492_v5, %v1356_v4  ;;  %v1485_v8 = vld [vmem:[#allocation6 + $0x14] sm:$0xf0]  ;;  %v1483_v9 = vld [vmem:[#allocation6 + $0xc] sm:$0xf]  ;;  %v1334_v12 = vld [vmem:[#allocation6 + $0x18] sm:$0xf0] }
  0x21   :  { %409 = vmatpush.bf16.msrb.mxu2 %v1789_v37  ;;  %422 = vmatpush.bf16.msrb.mxu3 %v1791_v38  ;;  %v1825_v13 = vor.u32 %v1485_v8, %v1332_v6  ;;  %v1827_v14 = vor.u32 %v1483_v9, %v1334_v12  ;;  %v1340_v15 = vld [vmem:[#allocation6 + $0x20] sm:$0xf]  ;;  %v1488_v16 = vld [vmem:[#allocation6 + $0x2c] sm:$0xf0]  ;;  %v1510_v26 = vld [vmem:[#allocation6 + $0xe4] sm:$0xf] }
  0x22   :  { %v1832_v17 = vor.u32 %v1488_v16, %v1340_v15  ;;  %v1324_v20 = vld [vmem:[#allocation6] sm:$0xf]  ;;  %v1484_v21 = vld [vmem:[#allocation6 + $0xc] sm:$0xf0]  ;;  %v1438_v27 = vld [vmem:[#allocation6 + $0xf0] sm:$0xf0] }
  0x23   :  { %383 = vmatpush.bf16.msra.mxu0 %v1805_v52  ;;  %v1835_v22 = vor.u32 %v1484_v21, %v1324_v20  ;;  %v1841_v31 = vor.u32 %v1510_v26, %v1438_v27  ;;  %v1506_v32 = vld [vmem:[#allocation6 + $0xc4] sm:$0xf]  ;;  %v1422_v34 = vld [vmem:[#allocation6 + $0xd0] sm:$0xf0]  ;;  %v1716_v35 = vmov 0.0  }
  0x24   :  { %v1847_v39 = vor.u32 %v1506_v32, %v1422_v34  ;;  %v1502_v40 = vld [vmem:[#allocation6 + $0xa4] sm:$0xf]  ;;  %v1406_v41 = vld [vmem:[#allocation6 + $0xb0] sm:$0xf0] }
  0x25   :  { %410 = vmatpush.bf16.msrb.mxu2 %v1798_v47  ;;  %423 = vmatpush.bf16.msrb.mxu3 %v1800_v48  ;;  %v1853_v42 = vor.u32 %v1502_v40, %v1406_v41  ;;  %v1498_v44 = vld [vmem:[#allocation6 + $0x84] sm:$0xf]  ;;  %v1390_v45 = vld [vmem:[#allocation6 + $0x90] sm:$0xf0] }
  0x26   :  { %v1861_v46 = vor.u32 %v1498_v44, %v1390_v45  ;;  %v1494_v49 = vld [vmem:[#allocation6 + $0x64] sm:$0xf]  ;;  %v1374_v50 = vld [vmem:[#allocation6 + $0x70] sm:$0xf0] }
  0x27   :  { %384 = vmatpush.bf16.msra.mxu0 %v1814_v61  ;;  %v1868_v51 = vor.u32 %v1494_v49, %v1374_v50  ;;  %v1490_v53 = vld [vmem:[#allocation6 + $0x44] sm:$0xf]  ;;  %v1358_v54 = vld [vmem:[#allocation6 + $0x50] sm:$0xf0] }
  0x28   :  { %v1874_v55 = vor.u32 %v1490_v53, %v1358_v54  ;;  %v1486_v58 = vld [vmem:[#allocation6 + $0x24] sm:$0xf]  ;;  %v1342_v59 = vld [vmem:[#allocation6 + $0x30] sm:$0xf0] }
  0x29   :  { %411 = vmatpush.bf16.msrb.mxu2 %v1807_v56  ;;  %424 = vmatpush.bf16.msrb.mxu3 %v1809_v57  ;;  %v1880_v60 = vor.u32 %v1486_v58, %v1342_v59  ;;  %v1482_v62 = vld [vmem:[#allocation6 + $0x4] sm:$0xf]  ;;  %v1326_v63 = vld [vmem:[#allocation6 + $0x10] sm:$0xf0] }
  0x2a   :  { %v1887_v1 = vor.u32 %v1482_v62, %v1326_v63 }
  0x2b   :  { %385 = vmatpush.bf16.msra.mxu0 %v1823_v7 }
  0x2d   :  { %412 = vmatpush.bf16.msrb.mxu2 %v1816_v2  ;;  %425 = vmatpush.bf16.msrb.mxu3 %v1818_v3 }
  0x2f   :  { %386 = vmatpush.bf16.msra.mxu0 %v1832_v17 }
  0x31   :  { %413 = vmatpush.bf16.msrb.mxu2 %v1825_v13  ;;  %426 = vmatpush.bf16.msrb.mxu3 %v1827_v14 }
  0x33   :  { %387 = vmatpush.bf16.msra.mxu0 %v1835_v22 }
  0x36   :  { %388 = vmatmul.bf16.vlgmr.msra.gmra.mxu0 %v1715_v0 }
  0x37   :  { %482 = vmatpush.bf16.msrb.mxu0 %v1776_v23 }
  0x3b   :  { %483 = vmatpush.bf16.msrb.mxu0 %v1787_v33 }
  0x3f   :  { %484 = vmatpush.bf16.msrb.mxu0 %v1796_v43 }
  0x43   :  { %485 = vmatpush.bf16.msrb.mxu0 %v1805_v52 }
  0x47   :  { %486 = vmatpush.bf16.msrb.mxu0 %v1814_v61 }
  0x4b   :  { %487 = vmatpush.bf16.msrb.mxu0 %v1823_v7 }
  0x4f   :  { %488 = vmatpush.bf16.msrb.mxu0 %v1832_v17 }
  0x53   :  { %489 = vmatpush.bf16.msrb.mxu0 %v1835_v22 }
  0x57   :  { %581 = vmatpush.bf16.msra.mxu0 %v1776_v23 }
  0x5b   :  { %582 = vmatpush.bf16.msra.mxu0 %v1787_v33 }
  0x5f   :  { %583 = vmatpush.bf16.msra.mxu0 %v1796_v43 }
  0x63   :  { %584 = vmatpush.bf16.msra.mxu0 %v1805_v52 }
  0x67   :  { %585 = vmatpush.bf16.msra.mxu0 %v1814_v61 }
  0x6b   :  { %586 = vmatpush.bf16.msra.mxu0 %v1823_v7 }
  0x6f   :  { %587 = vmatpush.bf16.msra.mxu0 %v1832_v17 }
  0x73   :  { %588 = vmatpush.bf16.msra.mxu0 %v1835_v22 }
  0x83   :  { %v77_v30 = vpop.permute.xlu0 %76 }
  0x84   :  { %vm78_vm1 = vcmp.eq.s32.totalorder %v77_v30, %v74_v25 }
  0x85   :  { %v1317_v36 = vsel %vm78_vm1, 1.0, %v1716_v35 }
  0x86   :  { %1318 = vmatmul.msk.f32.vlgmr.msra.gmra.mxu1 %vm99_vm0, %v1317_v36  ;;  %1320 = vmatmul.msk.f32.vlgmr.msra.gmra.mxu2 %vm99_vm0, %v1317_v36 }
  0x87   :  { %1321 = vmatmul.msk.f32.vlgmr.msra.gmra.mxu3 %vm99_vm0, %v1317_v36  ;;  %393 = vmatpush.bf16.msra.mxu1 %v1841_v31 }
  0x88   :  { %508 = vmatpush.bf16.msra.mxu2 %v1766_v10  ;;  %521 = vmatpush.bf16.msra.mxu3 %v1768_v11 }
  0x8b   :  { %394 = vmatpush.bf16.msra.mxu1 %v1847_v39 }
  0x8c   :  { %509 = vmatpush.bf16.msra.mxu2 %v1772_v18  ;;  %522 = vmatpush.bf16.msra.mxu3 %v1774_v19 }
  0x8e   :  { %1319 = vmatmul.msk.f32.vlgmr.msrb.gmra.mxu1 %vm99_vm0, %v1317_v36  ;;  %414 = vmatmul.bf16.vlgmr.msrb.gmra.mxu2 %v1715_v0 }
  0x8f   :  { %395 = vmatpush.bf16.msra.mxu1 %v1853_v42  ;;  %427 = vmatmul.bf16.vlgmr.msrb.gmra.mxu3 %v1715_v0 }
  0x90   :  { %510 = vmatpush.bf16.msra.mxu2 %v1781_v28  ;;  %523 = vmatpush.bf16.msra.mxu3 %v1783_v29 }
  0x93   :  { %396 = vmatpush.bf16.msra.mxu1 %v1861_v46 }
  0x94   :  { %511 = vmatpush.bf16.msra.mxu2 %v1789_v37  ;;  %524 = vmatpush.bf16.msra.mxu3 %v1791_v38 }
  0x97   :  { %397 = vmatpush.bf16.msra.mxu1 %v1868_v51 }
  0x98   :  { %512 = vmatpush.bf16.msra.mxu2 %v1798_v47  ;;  %525 = vmatpush.bf16.msra.mxu3 %v1800_v48 }
  0x9b   :  { %398 = vmatpush.bf16.msra.mxu1 %v1874_v55 }
  0x9c   :  { %513 = vmatpush.bf16.msra.mxu2 %v1807_v56  ;;  %526 = vmatpush.bf16.msra.mxu3 %v1809_v57 }
  0x9f   :  { %399 = vmatpush.bf16.msra.mxu1 %v1880_v60 }
  0xa0   :  { %514 = vmatpush.bf16.msra.mxu2 %v1816_v2  ;;  %527 = vmatpush.bf16.msra.mxu3 %v1818_v3 }
  0xa3   :  { %400 = vmatpush.bf16.msra.mxu1 %v1887_v1 }
  0xa4   :  { %515 = vmatpush.bf16.msra.mxu2 %v1825_v13  ;;  %528 = vmatpush.bf16.msra.mxu3 %v1827_v14 }
  0xa6   :  { %401 = vmatmul.bf16.vlgmr.msra.gmra.mxu1 %v1715_v0  ;;  %v89_v0 = vld [vmem:[%s2178_s3] sm:$0xf] }
  0xa7   :  { %495 = vmatpush.bf16.msrb.mxu1 %v1841_v31  ;;  %v91_v5 = vperm.slane %v89_v0, 0  ;;  %v93_v12 = vperm.slane %v89_v0, 2  ;;  %v94_v15 = vperm.slane %v89_v0, 3  ;;  %v92_v16 = vperm.slane %v89_v0, 1 }
  0xa8   :  { %607 = vmatpush.bf16.msrb.mxu2 %v1766_v10  ;;  %620 = vmatpush.bf16.msrb.mxu3 %v1768_v11 }
  0xab   :  { %496 = vmatpush.bf16.msrb.mxu1 %v1847_v39 }
  0xac   :  { %608 = vmatpush.bf16.msrb.mxu2 %v1772_v18  ;;  %621 = vmatpush.bf16.msrb.mxu3 %v1774_v19 }
  0xaf   :  { %497 = vmatpush.bf16.msrb.mxu1 %v1853_v42 }
  0xb0   :  { %609 = vmatpush.bf16.msrb.mxu2 %v1781_v28  ;;  %622 = vmatpush.bf16.msrb.mxu3 %v1783_v29 }
  0xb3   :  { %498 = vmatpush.bf16.msrb.mxu1 %v1861_v46  ;;  %v389_v4 = vpop.f32.mrf.mxu0 }
  0xb4   :  { %610 = vmatpush.bf16.msrb.mxu2 %v1789_v37  ;;  %623 = vmatpush.bf16.msrb.mxu3 %v1791_v38 }
  0xb7   :  { %499 = vmatpush.bf16.msrb.mxu1 %v1868_v51 }
  0xb8   :  { %611 = vmatpush.bf16.msrb.mxu2 %v1798_v47  ;;  %624 = vmatpush.bf16.msrb.mxu3 %v1800_v48 }
  0xbb   :  { %500 = vmatpush.bf16.msrb.mxu1 %v1874_v55  ;;  %v391_v9 = vpop.f32.mrf.mxu0 }
  0xbc   :  { %612 = vmatpush.bf16.msrb.mxu2 %v1807_v56  ;;  %625 = vmatpush.bf16.msrb.mxu3 %v1809_v57 }
  0xbf   :  { %501 = vmatpush.bf16.msrb.mxu1 %v1880_v60 }
  0xc0   :  { %613 = vmatpush.bf16.msrb.mxu2 %v1816_v2  ;;  %626 = vmatpush.bf16.msrb.mxu3 %v1818_v3 }
  0xc3   :  { %502 = vmatpush.bf16.msrb.mxu1 %v1887_v1 }
  0xc4   :  { %614 = vmatpush.bf16.msrb.mxu2 %v1825_v13  ;;  %627 = vmatpush.bf16.msrb.mxu3 %v1827_v14 }
  0xc7   :  { %594 = vmatpush.bf16.msra.mxu1 %v1841_v31 }
  0xcb   :  { %595 = vmatpush.bf16.msra.mxu1 %v1847_v39 }
  0xcf   :  { %596 = vmatpush.bf16.msra.mxu1 %v1853_v42 }
  0xd3   :  { %597 = vmatpush.bf16.msra.mxu1 %v1861_v46 }
  0xd7   :  { %598 = vmatpush.bf16.msra.mxu1 %v1868_v51 }
  0xdb   :  { %599 = vmatpush.bf16.msra.mxu1 %v1874_v55 }
  0xdf   :  { %600 = vmatpush.bf16.msra.mxu1 %v1880_v60 }
  0xe3   :  { %601 = vmatpush.bf16.msra.mxu1 %v1887_v1 }
 0x103   :  { %v120_v6 = vpop.f32.mrf.mxu1 }
 0x104   :  { %v121_v8 = vadd.f32 %v120_v6, %v91_v5 }
 0x106   :  { %183 = vst [vmem:[#allocation2] sm:$0xff] %v121_v8 }
 0x109   :  { %v160_v20 = vpop.f32.mrf.mxu2 }
 0x10a   :  { %v161_v21 = vadd.f32 %v160_v20, %v93_v12  ;;  %v180_v24 = vpop.f32.mrf.mxu3 }
 0x10b   :  { %v181_v25 = vadd.f32 %v180_v24, %v94_v15  ;;  %v140_v26 = vpop.f32.mrf.mxu1 }
 0x10c   :  { %185 = vst [vmem:[#allocation2 + $0x10] sm:$0xff] %v161_v21  ;;  %v141_v27 = vadd.f32 %v140_v26, %v92_v16 }
 0x10d   :  { %186 = vst [vmem:[#allocation2 + $0x18] sm:$0xff] %v181_v25 }
 0x10e   :  { %184 = vst [vmem:[#allocation2 + $0x8] sm:$0xff] %v141_v27 }
 0x111   :  { %v415_v30 = vpop.f32.mrf.mxu2 }
 0x112   :  { %v428_v32 = vpop.f32.mrf.mxu3  ;;  %v437_v36 = vrot.slane %v415_v30, 6 }
 0x113   :  { %v438_v40 = vrot.slane %v428_v32, 5 }
 0x115   :  { %v442_v44 = vsel %vm441_vm2, %v437_v36, %v438_v40  ;;  %v219_v50 = vld [vmem:[#allocation2] ss:$8 sm:$0xf] }
 0x119   :  { %v417_v34 = vpop.f32.mrf.mxu2 }
 0x11a   :  { %v430_v35 = vpop.f32.mrf.mxu3 }
 0x123   :  { %v402_v41 = vpop.f32.mrf.mxu1 }
 0x124   :  { %v436_v45 = vrot.slane %v402_v41, 7 }
 0x126   :  { %v440_v49 = vsel %vm439_vm3, %v389_v4, %v436_v45 }
 0x127   :  { %v444_v53 = vsel %vm443_vm4, %v440_v49, %v442_v44 }
 0x128   :  { %v446_v54 = vadd.f32 %v444_v53, %v219_v50 }
 0x12a   :  { %v447_v58 = vsub.f32 0.0, %v446_v54  ;;  %v466_v8 = vrot.slane %v446_v54, 3 }
 0x12b   :  { %v404_v59 = vpop.f32.mrf.mxu1 }
 0x12c   :  { %v448_v62 = vmul.f32 1.442695, %v447_v58 }
 0x12e   :  { %1536 = vpow2.f32 %v448_v62 }
 0x134   :  { %v1537_v63 = vpop.eup %1536 }
 0x135   :  { %v450_v0 = vadd.f32 1.0, %v1537_v63 }
 0x137   :  { %1538 = vrcp.f32 %v450_v0  ;;  %v462_v12 = vand.u32 2147483648, %v450_v0  ;;  %v460_v16 = vand.u32 2147483647, %v450_v0  ;;  %vm456_vm6 = vweird.f32 %v450_v0 }
 0x138   :  { %1540 = vtanh.f32 %v466_v8 }
 0x139   :  { %v463_v20 = vor.u32 1.1754944e-38, %v462_v12  ;;  %vm461_vm8 = vcmp.eq.f32.partialorder %v460_v16, 8.507059e+37 }
 0x13d   :  { %v1539_v5 = vpop.eup %1538 }
 0x13e   :  { %v452_v6 = vmul.f32 %v1539_v5, %v450_v0  ;;  %vm457_vm5 = vweird.f32 %v1539_v5  ;;  %v1541_v26 = vpop.eup %1540  ;;  %v480_v0 = vld [vmem:[#allocation2 + $0x1] ss:$8 sm:$0xf] }
 0x13f   :  { %vm458_vm7 = vmor %vm456_vm6, %vm457_vm5 }
 0x140   :  { %v453_v9 = vsub.f32 1.0, %v452_v6 }
 0x142   :  { %v454_v15 = vmul.f32 %v1539_v5, %v453_v9 }
 0x144   :  { %v455_v4 = vadd.f32 %v1539_v5, %v454_v15 }
 0x146   :  { %v459_v21 = vsel %vm458_vm7, %v1539_v5, %v455_v4 }
 0x147   :  { %v464_v24 = vsel %vm461_vm8, %v463_v20, %v459_v21  ;;  %vm1195_vm8 = vcmask 1042432  }
 0x148   :  { %v470_v25 = vrot.slane %v464_v24, 1  ;;  %v473_v30 = vmul.f32 %v1541_v26, %v464_v24  ;;  %v476_v34 = vrot.slane %v464_v24, 2 }
 0x14a   :  { %v472_v27 = vmul.f32 0.0, %v470_v25 }
 0x14c   :  { %v1940_v32 = vadd.f32 %v473_v30, %v472_v27 }
 0x14e   :  { %1542 = vtanh.f32 %v1940_v32 }
 0x154   :  { %v1543_v35 = vpop.eup %1542 }
 0x155   :  { %v1943_v36 = vmul.f32 %v1543_v35, %v476_v34 }
 0x157   :  { %v481_v40 = vpack.c.bf16 %v1943_v36, %v1943_v36 }
 0x159   :  { %490 = vmatmul.bf16.vlgmr.msrb.gmra.mxu0 %v481_v40  ;;  %503 = vmatmul.bf16.vlgmr.msrb.gmra.mxu1 %v481_v40 }
 0x15a   :  { %516 = vmatmul.bf16.vlgmr.msra.gmra.mxu2 %v481_v40  ;;  %529 = vmatmul.bf16.vlgmr.msra.gmra.mxu3 %v481_v40 }
 0x15b   :  { %680 = vmatpush.bf16.msrb.mxu0 %v1776_v23  ;;  %693 = vmatpush.bf16.msrb.mxu1 %v1841_v31 }
 0x15c   :  { %706 = vmatpush.bf16.msra.mxu2 %v1766_v10  ;;  %719 = vmatpush.bf16.msra.mxu3 %v1768_v11 }
 0x15f   :  { %681 = vmatpush.bf16.msrb.mxu0 %v1787_v33  ;;  %694 = vmatpush.bf16.msrb.mxu1 %v1847_v39 }
 0x160   :  { %707 = vmatpush.bf16.msra.mxu2 %v1772_v18  ;;  %720 = vmatpush.bf16.msra.mxu3 %v1774_v19 }
 0x163   :  { %682 = vmatpush.bf16.msrb.mxu0 %v1796_v43  ;;  %695 = vmatpush.bf16.msrb.mxu1 %v1853_v42 }
 0x164   :  { %708 = vmatpush.bf16.msra.mxu2 %v1781_v28  ;;  %721 = vmatpush.bf16.msra.mxu3 %v1783_v29 }
 0x167   :  { %683 = vmatpush.bf16.msrb.mxu0 %v1805_v52  ;;  %696 = vmatpush.bf16.msrb.mxu1 %v1861_v46 }
 0x168   :  { %709 = vmatpush.bf16.msra.mxu2 %v1789_v37  ;;  %722 = vmatpush.bf16.msra.mxu3 %v1791_v38 }
 0x16b   :  { %684 = vmatpush.bf16.msrb.mxu0 %v1814_v61  ;;  %697 = vmatpush.bf16.msrb.mxu1 %v1868_v51 }
 0x16c   :  { %710 = vmatpush.bf16.msra.mxu2 %v1798_v47  ;;  %723 = vmatpush.bf16.msra.mxu3 %v1800_v48 }
 0x16f   :  { %685 = vmatpush.bf16.msrb.mxu0 %v1823_v7  ;;  %698 = vmatpush.bf16.msrb.mxu1 %v1874_v55 }
 0x170   :  { %711 = vmatpush.bf16.msra.mxu2 %v1807_v56  ;;  %724 = vmatpush.bf16.msra.mxu3 %v1809_v57 }
 0x173   :  { %686 = vmatpush.bf16.msrb.mxu0 %v1832_v17  ;;  %699 = vmatpush.bf16.msrb.mxu1 %v1880_v60 }
 0x174   :  { %712 = vmatpush.bf16.msra.mxu2 %v1816_v2  ;;  %725 = vmatpush.bf16.msra.mxu3 %v1818_v3 }
 0x177   :  { %687 = vmatpush.bf16.msrb.mxu0 %v1835_v22  ;;  %700 = vmatpush.bf16.msrb.mxu1 %v1887_v1 }
 0x178   :  { %713 = vmatpush.bf16.msra.mxu2 %v1825_v13  ;;  %726 = vmatpush.bf16.msra.mxu3 %v1827_v14 }
 0x1d6   :  { %v491_v41 = vpop.f32.mrf.mxu0  ;;  %v504_v44 = vpop.f32.mrf.mxu1 }
 0x1d7   :  { %v538_v45 = vrot.slane %v504_v44, 7 }
 0x1d9   :  { %v541_v62 = vsel %vm439_vm3, %v491_v41, %v538_v45 }
 0x1dd   :  { %v517_v49 = vpop.f32.mrf.mxu2  ;;  %v530_v50 = vpop.f32.mrf.mxu3 }
 0x1de   :  { %v539_v53 = vrot.slane %v517_v49, 6  ;;  %v540_v54 = vrot.slane %v530_v50, 5  ;;  %v493_v58 = vpop.f32.mrf.mxu0  ;;  %v506_v59 = vpop.f32.mrf.mxu1 }
 0x1e0   :  { %v542_v63 = vsel %vm441_vm2, %v539_v53, %v540_v54 }
 0x1e1   :  { %v543_v5 = vsel %vm443_vm4, %v541_v62, %v542_v63 }
 0x1e2   :  { %v545_v6 = vadd.f32 %v543_v5, %v480_v0 }
 0x1e4   :  { %v546_v8 = vsub.f32 0.0, %v545_v6  ;;  %v565_v24 = vrot.slane %v545_v6, 3 }
 0x1e5   :  { %v519_v9 = vpop.f32.mrf.mxu2  ;;  %v532_v12 = vpop.f32.mrf.mxu3 }
 0x1e6   :  { %v547_v15 = vmul.f32 1.442695, %v546_v8 }
 0x1e8   :  { %1544 = vpow2.f32 %v547_v15 }
 0x1ee   :  { %v1545_v16 = vpop.eup %1544 }
 0x1ef   :  { %v549_v4 = vadd.f32 1.0, %v1545_v16 }
 0x1f1   :  { %1546 = vrcp.f32 %v549_v4  ;;  %v561_v26 = vand.u32 2147483648, %v549_v4  ;;  %v559_v30 = vand.u32 2147483647, %v549_v4  ;;  %vm555_vm10 = vweird.f32 %v549_v4 }
 0x1f2   :  { %1548 = vtanh.f32 %v565_v24 }
 0x1f3   :  { %v562_v35 = vor.u32 1.1754944e-38, %v561_v26  ;;  %vm560_vm12 = vcmp.eq.f32.partialorder %v559_v30, 8.507059e+37 }
 0x1f7   :  { %v1547_v20 = vpop.eup %1546 }
 0x1f8   :  { %v551_v21 = vmul.f32 %v1547_v20, %v549_v4  ;;  %vm556_vm9 = vweird.f32 %v1547_v20  ;;  %v1549_v45 = vpop.eup %1548 }
 0x1f9   :  { %vm557_vm11 = vmor %vm555_vm10, %vm556_vm9 }
 0x1fa   :  { %v552_v25 = vsub.f32 1.0, %v551_v21 }
 0x1fc   :  { %v553_v27 = vmul.f32 %v1547_v20, %v552_v25 }
 0x1fe   :  { %v554_v34 = vadd.f32 %v1547_v20, %v553_v27 }
 0x200   :  { %v558_v40 = vsel %vm557_vm11, %v1547_v20, %v554_v34  ;;  %v579_v20 = vld [vmem:[#allocation2 + $0x2] ss:$8 sm:$0xf] }
 0x201   :  { %v563_v41 = vsel %vm560_vm12, %v562_v35, %v558_v40 }
 0x202   :  { %v569_v44 = vrot.slane %v563_v41, 1  ;;  %v572_v50 = vmul.f32 %v1549_v45, %v563_v41  ;;  %v575_v54 = vrot.slane %v563_v41, 2 }
 0x204   :  { %v571_v49 = vmul.f32 %v569_v44, %v1940_v32 }
 0x206   :  { %v1983_v53 = vadd.f32 %v572_v50, %v571_v49 }
 0x208   :  { %1550 = vtanh.f32 %v1983_v53 }
 0x20e   :  { %v1551_v58 = vpop.eup %1550 }
 0x20f   :  { %v1986_v59 = vmul.f32 %v1551_v58, %v575_v54 }
 0x211   :  { %v580_v62 = vpack.c.bf16 %v1986_v59, %v1986_v59 }
 0x213   :  { %589 = vmatmul.bf16.vlgmr.msra.gmra.mxu0 %v580_v62  ;;  %602 = vmatmul.bf16.vlgmr.msra.gmra.mxu1 %v580_v62 }
 0x214   :  { %615 = vmatmul.bf16.vlgmr.msrb.gmra.mxu2 %v580_v62  ;;  %628 = vmatmul.bf16.vlgmr.msrb.gmra.mxu3 %v580_v62 }
 0x215   :  { %779 = vmatpush.bf16.msra.mxu0 %v1776_v23  ;;  %792 = vmatpush.bf16.msra.mxu1 %v1841_v31 }
 0x216   :  { %805 = vmatpush.bf16.msrb.mxu2 %v1766_v10  ;;  %818 = vmatpush.bf16.msrb.mxu3 %v1768_v11 }
 0x219   :  { %780 = vmatpush.bf16.msra.mxu0 %v1787_v33  ;;  %793 = vmatpush.bf16.msra.mxu1 %v1847_v39 }
 0x21a   :  { %806 = vmatpush.bf16.msrb.mxu2 %v1772_v18  ;;  %819 = vmatpush.bf16.msrb.mxu3 %v1774_v19 }
 0x21d   :  { %781 = vmatpush.bf16.msra.mxu0 %v1796_v43  ;;  %794 = vmatpush.bf16.msra.mxu1 %v1853_v42 }
 0x21e   :  { %807 = vmatpush.bf16.msrb.mxu2 %v1781_v28  ;;  %820 = vmatpush.bf16.msrb.mxu3 %v1783_v29 }
 0x221   :  { %782 = vmatpush.bf16.msra.mxu0 %v1805_v52  ;;  %795 = vmatpush.bf16.msra.mxu1 %v1861_v46 }
 0x222   :  { %808 = vmatpush.bf16.msrb.mxu2 %v1789_v37  ;;  %821 = vmatpush.bf16.msrb.mxu3 %v1791_v38 }
 0x225   :  { %783 = vmatpush.bf16.msra.mxu0 %v1814_v61  ;;  %796 = vmatpush.bf16.msra.mxu1 %v1868_v51 }
 0x226   :  { %809 = vmatpush.bf16.msrb.mxu2 %v1798_v47  ;;  %822 = vmatpush.bf16.msrb.mxu3 %v1800_v48 }
 0x229   :  { %784 = vmatpush.bf16.msra.mxu0 %v1823_v7  ;;  %797 = vmatpush.bf16.msra.mxu1 %v1874_v55 }
 0x22a   :  { %810 = vmatpush.bf16.msrb.mxu2 %v1807_v56  ;;  %823 = vmatpush.bf16.msrb.mxu3 %v1809_v57 }
 0x22d   :  { %785 = vmatpush.bf16.msra.mxu0 %v1832_v17  ;;  %798 = vmatpush.bf16.msra.mxu1 %v1880_v60 }
 0x22e   :  { %811 = vmatpush.bf16.msrb.mxu2 %v1816_v2  ;;  %824 = vmatpush.bf16.msrb.mxu3 %v1818_v3 }
 0x231   :  { %786 = vmatpush.bf16.msra.mxu0 %v1835_v22  ;;  %799 = vmatpush.bf16.msra.mxu1 %v1887_v1 }
 0x232   :  { %812 = vmatpush.bf16.msrb.mxu2 %v1825_v13  ;;  %825 = vmatpush.bf16.msrb.mxu3 %v1827_v14 }
 0x290   :  { %v590_v32 = vpop.f32.mrf.mxu0  ;;  %v603_v63 = vpop.f32.mrf.mxu1 }
 0x291   :  { %v637_v0 = vrot.slane %v603_v63, 7 }
 0x293   :  { %v640_v16 = vsel %vm439_vm3, %v590_v32, %v637_v0 }
 0x297   :  { %v616_v5 = vpop.f32.mrf.mxu2  ;;  %v629_v6 = vpop.f32.mrf.mxu3 }
 0x298   :  { %v638_v8 = vrot.slane %v616_v5, 6  ;;  %v639_v9 = vrot.slane %v629_v6, 5  ;;  %v592_v12 = vpop.f32.mrf.mxu0  ;;  %v605_v15 = vpop.f32.mrf.mxu1 }
 0x29a   :  { %v641_v4 = vsel %vm441_vm2, %v638_v8, %v639_v9 }
 0x29b   :  { %v642_v21 = vsel %vm443_vm4, %v640_v16, %v641_v4  ;;  %v1173_v16 = vperm.slane %v1986_v59, 0 }
 0x29c   :  { %v644_v24 = vadd.f32 %v642_v21, %v579_v20 }
 0x29e   :  { %v645_v25 = vsub.f32 0.0, %v644_v24  ;;  %v664_v44 = vrot.slane %v644_v24, 3  ;;  %v1193_v24 = vsel %vm439_vm3, %v1943_v36, %v1173_v16 }
 0x29f   :  { %v618_v26 = vpop.f32.mrf.mxu2  ;;  %v631_v27 = vpop.f32.mrf.mxu3 }
 0x2a0   :  { %v646_v30 = vmul.f32 1.442695, %v645_v25 }
 0x2a2   :  { %1552 = vpow2.f32 %v646_v30 }
 0x2a8   :  { %v1553_v34 = vpop.eup %1552 }
 0x2a9   :  { %v648_v35 = vadd.f32 1.0, %v1553_v34 }
 0x2ab   :  { %1554 = vrcp.f32 %v648_v35  ;;  %v660_v49 = vand.u32 2147483648, %v648_v35  ;;  %v658_v54 = vand.u32 2147483647, %v648_v35  ;;  %vm654_vm14 = vweird.f32 %v648_v35 }
 0x2ac   :  { %1556 = vtanh.f32 %v664_v44 }
 0x2ad   :  { %v661_v62 = vor.u32 1.1754944e-38, %v660_v49  ;;  %vm659_vm0 = vcmp.eq.f32.partialorder %v658_v54, 8.507059e+37 }
 0x2b1   :  { %v1555_v40 = vpop.eup %1554 }
 0x2b2   :  { %v650_v41 = vmul.f32 %v1555_v40, %v648_v35  ;;  %vm655_vm13 = vweird.f32 %v1555_v40  ;;  %v1557_v5 = vpop.eup %1556 }
 0x2b3   :  { %vm656_vm15 = vmor %vm654_vm14, %vm655_vm13  ;;  %vm1197_vm13 = vcmask 1043456  }
 0x2b4   :  { %v651_v45 = vsub.f32 1.0, %v650_v41 }
 0x2b6   :  { %v652_v50 = vmul.f32 %v1555_v40, %v651_v45  ;;  %v678_v45 = vld [vmem:[#allocation2 + $0x3] ss:$8 sm:$0xf] }
 0x2b8   :  { %v653_v58 = vadd.f32 %v1555_v40, %v652_v50 }
 0x2ba   :  { %v657_v32 = vsel %vm656_vm15, %v1555_v40, %v653_v58 }
 0x2bb   :  { %v662_v63 = vsel %vm659_vm0, %v661_v62, %v657_v32 }
 0x2bc   :  { %v668_v0 = vrot.slane %v662_v63, 1  ;;  %v671_v8 = vmul.f32 %v1557_v5, %v662_v63  ;;  %v674_v12 = vrot.slane %v662_v63, 2 }
 0x2be   :  { %v670_v6 = vmul.f32 %v668_v0, %v1983_v53 }
 0x2c0   :  { %v2026_v9 = vadd.f32 %v671_v8, %v670_v6 }
 0x2c2   :  { %1558 = vtanh.f32 %v2026_v9 }
 0x2c8   :  { %v1559_v15 = vpop.eup %1558 }
 0x2c9   :  { %v676_v4 = vmul.f32 %v1559_v15, %v674_v12 }
 0x2cb   :  { %v679_v20 = vpack.c.bf16 %v676_v4, %v676_v4  ;;  %v1176_v21 = vperm.slane %v676_v4, 0 }
 0x2cd   :  { %688 = vmatmul.bf16.vlgmr.msrb.gmra.mxu0 %v679_v20  ;;  %v2033_v25 = vsel %vm443_vm4, %v1193_v24, %v1176_v21  ;;  %701 = vmatmul.bf16.vlgmr.msrb.gmra.mxu1 %v679_v20 }
 0x2ce   :  { %714 = vmatmul.bf16.vlgmr.msra.gmra.mxu2 %v679_v20  ;;  %727 = vmatmul.bf16.vlgmr.msra.gmra.mxu3 %v679_v20 }
 0x2cf   :  { %878 = vmatpush.bf16.msrb.mxu0 %v1776_v23  ;;  %891 = vmatpush.bf16.msrb.mxu1 %v1841_v31 }
 0x2d0   :  { %904 = vmatpush.bf16.msra.mxu2 %v1766_v10  ;;  %917 = vmatpush.bf16.msra.mxu3 %v1768_v11 }
 0x2d3   :  { %879 = vmatpush.bf16.msrb.mxu0 %v1787_v33  ;;  %892 = vmatpush.bf16.msrb.mxu1 %v1847_v39 }
 0x2d4   :  { %905 = vmatpush.bf16.msra.mxu2 %v1772_v18  ;;  %918 = vmatpush.bf16.msra.mxu3 %v1774_v19 }
 0x2d7   :  { %880 = vmatpush.bf16.msrb.mxu0 %v1796_v43  ;;  %893 = vmatpush.bf16.msrb.mxu1 %v1853_v42 }
 0x2d8   :  { %906 = vmatpush.bf16.msra.mxu2 %v1781_v28  ;;  %919 = vmatpush.bf16.msra.mxu3 %v1783_v29 }
 0x2db   :  { %881 = vmatpush.bf16.msrb.mxu0 %v1805_v52  ;;  %894 = vmatpush.bf16.msrb.mxu1 %v1861_v46 }
 0x2dc   :  { %907 = vmatpush.bf16.msra.mxu2 %v1789_v37  ;;  %920 = vmatpush.bf16.msra.mxu3 %v1791_v38 }
 0x2df   :  { %882 = vmatpush.bf16.msrb.mxu0 %v1814_v61  ;;  %895 = vmatpush.bf16.msrb.mxu1 %v1868_v51 }
 0x2e0   :  { %908 = vmatpush.bf16.msra.mxu2 %v1798_v47  ;;  %921 = vmatpush.bf16.msra.mxu3 %v1800_v48 }
 0x2e3   :  { %883 = vmatpush.bf16.msrb.mxu0 %v1823_v7  ;;  %896 = vmatpush.bf16.msrb.mxu1 %v1874_v55 }
 0x2e4   :  { %909 = vmatpush.bf16.msra.mxu2 %v1807_v56  ;;  %922 = vmatpush.bf16.msra.mxu3 %v1809_v57 }
 0x2e7   :  { %884 = vmatpush.bf16.msrb.mxu0 %v1832_v17  ;;  %897 = vmatpush.bf16.msrb.mxu1 %v1880_v60 }
 0x2e8   :  { %910 = vmatpush.bf16.msra.mxu2 %v1816_v2  ;;  %923 = vmatpush.bf16.msra.mxu3 %v1818_v3 }
 0x2eb   :  { %885 = vmatpush.bf16.msrb.mxu0 %v1835_v22  ;;  %898 = vmatpush.bf16.msrb.mxu1 %v1887_v1 }
 0x2ec   :  { %911 = vmatpush.bf16.msra.mxu2 %v1825_v13  ;;  %924 = vmatpush.bf16.msra.mxu3 %v1827_v14 }
 0x34a   :  { %v689_v36 = vpop.f32.mrf.mxu0  ;;  %v702_v53 = vpop.f32.mrf.mxu1 }
 0x34b   :  { %v736_v59 = vrot.slane %v702_v53, 7 }
 0x34d   :  { %v739_v41 = vsel %vm439_vm3, %v689_v36, %v736_v59 }
 0x351   :  { %v715_v26 = vpop.f32.mrf.mxu2  ;;  %v728_v27 = vpop.f32.mrf.mxu3 }
 0x352   :  { %v737_v30 = vrot.slane %v715_v26, 6  ;;  %v738_v34 = vrot.slane %v728_v27, 5  ;;  %v691_v35 = vpop.f32.mrf.mxu0  ;;  %v704_v40 = vpop.f32.mrf.mxu1 }
 0x354   :  { %v740_v44 = vsel %vm441_vm2, %v737_v30, %v738_v34 }
 0x355   :  { %v741_v49 = vsel %vm443_vm4, %v739_v41, %v740_v44 }
 0x356   :  { %v743_v50 = vadd.f32 %v741_v49, %v678_v45 }
 0x358   :  { %v744_v54 = vsub.f32 0.0, %v743_v50  ;;  %v763_v8 = vrot.slane %v743_v50, 3 }
 0x359   :  { %v717_v58 = vpop.f32.mrf.mxu2  ;;  %v730_v62 = vpop.f32.mrf.mxu3 }
 0x35a   :  { %v745_v32 = vmul.f32 1.442695, %v744_v54 }
 0x35c   :  { %1560 = vpow2.f32 %v745_v32 }
 0x362   :  { %v1561_v63 = vpop.eup %1560 }
 0x363   :  { %v747_v0 = vadd.f32 1.0, %v1561_v63 }
 0x365   :  { %1562 = vrcp.f32 %v747_v0  ;;  %v759_v15 = vand.u32 2147483648, %v747_v0  ;;  %v757_v4 = vand.u32 2147483647, %v747_v0  ;;  %vm753_vm5 = vweird.f32 %v747_v0 }
 0x366   :  { %1564 = vtanh.f32 %v763_v8 }
 0x367   :  { %v760_v21 = vor.u32 1.1754944e-38, %v759_v15  ;;  %vm758_vm7 = vcmp.eq.f32.partialorder %v757_v4, 8.507059e+37 }
 0x36b   :  { %v1563_v5 = vpop.eup %1562 }
 0x36c   :  { %v749_v6 = vmul.f32 %v1563_v5, %v747_v0  ;;  %vm754_vm1 = vweird.f32 %v1563_v5  ;;  %v1565_v59 = vpop.eup %1564 }
 0x36d   :  { %vm755_vm6 = vmor %vm753_vm5, %vm754_vm1  ;;  %vm1199_vm5 = vcmask 1044480  }
 0x36e   :  { %v750_v12 = vsub.f32 1.0, %v749_v6  ;;  %v777_v6 = vld [vmem:[#allocation2 + $0x4] ss:$8 sm:$0xf] }
 0x370   :  { %v751_v16 = vmul.f32 %v1563_v5, %v750_v12 }
 0x372   :  { %v752_v20 = vadd.f32 %v1563_v5, %v751_v16 }
 0x374   :  { %v756_v24 = vsel %vm755_vm6, %v1563_v5, %v752_v20 }
 0x375   :  { %v761_v36 = vsel %vm758_vm7, %v760_v21, %v756_v24 }
 0x376   :  { %v767_v53 = vrot.slane %v761_v36, 1  ;;  %v770_v27 = vmul.f32 %v1565_v59, %v761_v36  ;;  %v773_v34 = vrot.slane %v761_v36, 2 }
 0x378   :  { %v769_v26 = vmul.f32 %v767_v53, %v2026_v9 }
 0x37a   :  { %v2071_v30 = vadd.f32 %v770_v27, %v769_v26 }
 0x37c   :  { %1566 = vtanh.f32 %v2071_v30 }
 0x382   :  { %v1567_v35 = vpop.eup %1566 }
 0x383   :  { %v775_v40 = vmul.f32 %v1567_v35, %v773_v34 }
 0x385   :  { %v778_v41 = vpack.c.bf16 %v775_v40, %v775_v40  ;;  %v1179_v44 = vperm.slane %v775_v40, 0 }
 0x387   :  { %787 = vmatmul.bf16.vlgmr.msra.gmra.mxu0 %v778_v41  ;;  %v2075_v45 = vsel %vm1195_vm8, %v2033_v25, %v1179_v44  ;;  %800 = vmatmul.bf16.vlgmr.msra.gmra.mxu1 %v778_v41 }
 0x388   :  { %813 = vmatmul.bf16.vlgmr.msrb.gmra.mxu2 %v778_v41  ;;  %826 = vmatmul.bf16.vlgmr.msrb.gmra.mxu3 %v778_v41 }
 0x389   :  { %977 = vmatpush.bf16.msra.mxu0 %v1776_v23  ;;  %990 = vmatpush.bf16.msra.mxu1 %v1841_v31 }
 0x38a   :  { %1003 = vmatpush.bf16.msrb.mxu2 %v1766_v10  ;;  %1016 = vmatpush.bf16.msrb.mxu3 %v1768_v11 }
 0x38d   :  { %978 = vmatpush.bf16.msra.mxu0 %v1787_v33  ;;  %991 = vmatpush.bf16.msra.mxu1 %v1847_v39 }
 0x38e   :  { %1004 = vmatpush.bf16.msrb.mxu2 %v1772_v18  ;;  %1017 = vmatpush.bf16.msrb.mxu3 %v1774_v19 }
 0x391   :  { %979 = vmatpush.bf16.msra.mxu0 %v1796_v43  ;;  %992 = vmatpush.bf16.msra.mxu1 %v1853_v42 }
 0x392   :  { %1005 = vmatpush.bf16.msrb.mxu2 %v1781_v28  ;;  %1018 = vmatpush.bf16.msrb.mxu3 %v1783_v29 }
 0x395   :  { %980 = vmatpush.bf16.msra.mxu0 %v1805_v52  ;;  %993 = vmatpush.bf16.msra.mxu1 %v1861_v46 }
 0x396   :  { %1006 = vmatpush.bf16.msrb.mxu2 %v1789_v37  ;;  %1019 = vmatpush.bf16.msrb.mxu3 %v1791_v38 }
 0x399   :  { %981 = vmatpush.bf16.msra.mxu0 %v1814_v61  ;;  %994 = vmatpush.bf16.msra.mxu1 %v1868_v51 }
 0x39a   :  { %1007 = vmatpush.bf16.msrb.mxu2 %v1798_v47  ;;  %1020 = vmatpush.bf16.msrb.mxu3 %v1800_v48 }
 0x39d   :  { %982 = vmatpush.bf16.msra.mxu0 %v1823_v7  ;;  %995 = vmatpush.bf16.msra.mxu1 %v1874_v55 }
 0x39e   :  { %1008 = vmatpush.bf16.msrb.mxu2 %v1807_v56  ;;  %1021 = vmatpush.bf16.msrb.mxu3 %v1809_v57 }
 0x3a1   :  { %983 = vmatpush.bf16.msra.mxu0 %v1832_v17  ;;  %996 = vmatpush.bf16.msra.mxu1 %v1880_v60 }
 0x3a2   :  { %1009 = vmatpush.bf16.msrb.mxu2 %v1816_v2  ;;  %1022 = vmatpush.bf16.msrb.mxu3 %v1818_v3 }
 0x3a5   :  { %984 = vmatpush.bf16.msra.mxu0 %v1835_v22  ;;  %997 = vmatpush.bf16.msra.mxu1 %v1887_v1 }
 0x3a6   :  { %1010 = vmatpush.bf16.msrb.mxu2 %v1825_v13  ;;  %1023 = vmatpush.bf16.msrb.mxu3 %v1827_v14 }
 0x404   :  { %v788_v9 = vpop.f32.mrf.mxu0  ;;  %v801_v25 = vpop.f32.mrf.mxu1 }
 0x405   :  { %v835_v49 = vrot.slane %v801_v25, 7 }
 0x407   :  { %v838_v0 = vsel %vm439_vm3, %v788_v9, %v835_v49 }
 0x40b   :  { %v814_v50 = vpop.f32.mrf.mxu2  ;;  %v827_v54 = vpop.f32.mrf.mxu3 }
 0x40c   :  { %v836_v58 = vrot.slane %v814_v50, 6  ;;  %v837_v62 = vrot.slane %v827_v54, 5  ;;  %v790_v32 = vpop.f32.mrf.mxu0  ;;  %v803_v63 = vpop.f32.mrf.mxu1 }
 0x40e   :  { %v839_v5 = vsel %vm441_vm2, %v836_v58, %v837_v62 }
 0x40f   :  { %v840_v8 = vsel %vm443_vm4, %v838_v0, %v839_v5 }
 0x410   :  { %v842_v12 = vadd.f32 %v840_v8, %v777_v6 }
 0x412   :  { %v843_v15 = vsub.f32 0.0, %v842_v12  ;;  %v862_v59 = vrot.slane %v842_v12, 3 }
 0x413   :  { %v816_v16 = vpop.f32.mrf.mxu2  ;;  %v829_v4 = vpop.f32.mrf.mxu3 }
 0x414   :  { %v844_v20 = vmul.f32 1.442695, %v843_v15 }
 0x416   :  { %1568 = vpow2.f32 %v844_v20 }
 0x41c   :  { %v1569_v21 = vpop.eup %1568 }
 0x41d   :  { %v846_v24 = vadd.f32 1.0, %v1569_v21 }
 0x41f   :  { %1570 = vrcp.f32 %v846_v24  ;;  %v858_v27 = vand.u32 2147483648, %v846_v24  ;;  %v856_v35 = vand.u32 2147483647, %v846_v24  ;;  %vm852_vm10 = vweird.f32 %v846_v24 }
 0x420   :  { %1572 = vtanh.f32 %v862_v59 }
 0x421   :  { %v859_v41 = vor.u32 1.1754944e-38, %v858_v27  ;;  %vm857_vm12 = vcmp.eq.f32.partialorder %v856_v35, 8.507059e+37 }
 0x425   :  { %v1571_v36 = vpop.eup %1570 }
 0x426   :  { %v848_v53 = vmul.f32 %v1571_v36, %v846_v24  ;;  %vm853_vm9 = vweird.f32 %v1571_v36  ;;  %v1573_v49 = vpop.eup %1572 }
 0x427   :  { %vm854_vm11 = vmor %vm852_vm10, %vm853_vm9  ;;  %vm1201_vm10 = vcmask 1045504  }
 0x428   :  { %v849_v26 = vsub.f32 1.0, %v848_v53 }
 0x42a   :  { %v850_v34 = vmul.f32 %v1571_v36, %v849_v26 }
 0x42c   :  { %v851_v40 = vadd.f32 %v1571_v36, %v850_v34 }
 0x42e   :  { %v855_v44 = vsel %vm854_vm11, %v1571_v36, %v851_v40 }
 0x42f   :  { %v860_v9 = vsel %vm857_vm12, %v859_v41, %v855_v44  ;;  %vm1203_vm12 = vcmask 1046528  }
 0x430   :  { %v866_v25 = vrot.slane %v860_v9, 1  ;;  %v869_v54 = vmul.f32 %v1573_v49, %v860_v9  ;;  %v872_v62 = vrot.slane %v860_v9, 2 }
 0x432   :  { %v868_v50 = vmul.f32 %v866_v25, %v2071_v30  ;;  %v975_v25 = vld [vmem:[#allocation2 + $0x6] ss:$8 sm:$0xf] }
 0x434   :  { %v2113_v58 = vadd.f32 %v869_v54, %v868_v50 }
 0x436   :  { %1574 = vtanh.f32 %v2113_v58 }
 0x43c   :  { %v1575_v32 = vpop.eup %1574 }
 0x43d   :  { %v874_v63 = vmul.f32 %v1575_v32, %v872_v62 }
 0x43f   :  { %v877_v0 = vpack.c.bf16 %v874_v63, %v874_v63  ;;  %v1182_v5 = vperm.slane %v874_v63, 0 }
 0x441   :  { %886 = vmatmul.bf16.vlgmr.msrb.gmra.mxu0 %v877_v0  ;;  %899 = vmatmul.bf16.vlgmr.msrb.gmra.mxu1 %v877_v0  ;;  %v2117_v6 = vsel %vm1197_vm13, %v2075_v45, %v1182_v5 }
 0x442   :  { %912 = vmatmul.bf16.vlgmr.msra.gmra.mxu2 %v877_v0  ;;  %925 = vmatmul.bf16.vlgmr.msra.gmra.mxu3 %v877_v0 }
 0x443   :  { %1076 = vmatpush.bf16.msrb.mxu0 %v1776_v23  ;;  %1089 = vmatpush.bf16.msrb.mxu1 %v1841_v31 }
 0x444   :  { %1102 = vmatpush.bf16.msra.mxu2 %v1766_v10  ;;  %1115 = vmatpush.bf16.msra.mxu3 %v1768_v11 }
 0x447   :  { %1077 = vmatpush.bf16.msrb.mxu0 %v1787_v33  ;;  %1090 = vmatpush.bf16.msrb.mxu1 %v1847_v39 }
 0x448   :  { %1103 = vmatpush.bf16.msra.mxu2 %v1772_v18  ;;  %1116 = vmatpush.bf16.msra.mxu3 %v1774_v19 }
 0x44b   :  { %1078 = vmatpush.bf16.msrb.mxu0 %v1796_v43  ;;  %1091 = vmatpush.bf16.msrb.mxu1 %v1853_v42 }
 0x44c   :  { %1104 = vmatpush.bf16.msra.mxu2 %v1781_v28  ;;  %1117 = vmatpush.bf16.msra.mxu3 %v1783_v29 }
 0x44f   :  { %1079 = vmatpush.bf16.msrb.mxu0 %v1805_v52  ;;  %1092 = vmatpush.bf16.msrb.mxu1 %v1861_v46 }
 0x450   :  { %1105 = vmatpush.bf16.msra.mxu2 %v1789_v37  ;;  %1118 = vmatpush.bf16.msra.mxu3 %v1791_v38 }
 0x453   :  { %1080 = vmatpush.bf16.msrb.mxu0 %v1814_v61  ;;  %1093 = vmatpush.bf16.msrb.mxu1 %v1868_v51 }
 0x454   :  { %1106 = vmatpush.bf16.msra.mxu2 %v1798_v47  ;;  %1119 = vmatpush.bf16.msra.mxu3 %v1800_v48  ;;  %v876_v47 = vld [vmem:[#allocation2 + $0x5] ss:$8 sm:$0xf] }
 0x457   :  { %1081 = vmatpush.bf16.msrb.mxu0 %v1823_v7  ;;  %1094 = vmatpush.bf16.msrb.mxu1 %v1874_v55 }
 0x458   :  { %1107 = vmatpush.bf16.msra.mxu2 %v1807_v56  ;;  %1120 = vmatpush.bf16.msra.mxu3 %v1809_v57 }
 0x45b   :  { %1082 = vmatpush.bf16.msrb.mxu0 %v1832_v17  ;;  %1095 = vmatpush.bf16.msrb.mxu1 %v1880_v60 }
 0x45c   :  { %1108 = vmatpush.bf16.msra.mxu2 %v1816_v2  ;;  %1121 = vmatpush.bf16.msra.mxu3 %v1818_v3 }
 0x45f   :  { %1083 = vmatpush.bf16.msrb.mxu0 %v1835_v22  ;;  %1096 = vmatpush.bf16.msrb.mxu1 %v1887_v1 }
 0x460   :  { %1109 = vmatpush.bf16.msra.mxu2 %v1825_v13  ;;  %1122 = vmatpush.bf16.msra.mxu3 %v1827_v14 }
 0x4be   :  { %v887_v10 = vpop.f32.mrf.mxu0  ;;  %v900_v11 = vpop.f32.mrf.mxu1 }
 0x4bf   :  { %v934_v18 = vrot.slane %v900_v11, 7 }
 0x4c1   :  { %v937_v38 = vsel %vm439_vm3, %v887_v10, %v934_v18 }
 0x4c5   :  { %v913_v19 = vpop.f32.mrf.mxu2  ;;  %v926_v23 = vpop.f32.mrf.mxu3 }
 0x4c6   :  { %v935_v28 = vrot.slane %v913_v19, 6  ;;  %v936_v29 = vrot.slane %v926_v23, 5  ;;  %v889_v33 = vpop.f32.mrf.mxu0  ;;  %v902_v37 = vpop.f32.mrf.mxu1 }
 0x4c8   :  { %v938_v43 = vsel %vm441_vm2, %v935_v28, %v936_v29 }
 0x4c9   :  { %v939_v48 = vsel %vm443_vm4, %v937_v38, %v938_v43 }
 0x4ca   :  { %v941_v52 = vadd.f32 %v939_v48, %v876_v47 }
 0x4cc   :  { %v942_v56 = vsub.f32 0.0, %v941_v52  ;;  %v961_v17 = vrot.slane %v941_v52, 3 }
 0x4cd   :  { %v915_v57 = vpop.f32.mrf.mxu2  ;;  %v928_v61 = vpop.f32.mrf.mxu3 }
 0x4ce   :  { %v943_v2 = vmul.f32 1.442695, %v942_v56 }
 0x4d0   :  { %1576 = vpow2.f32 %v943_v2 }
 0x4d6   :  { %v1577_v3 = vpop.eup %1576 }
 0x4d7   :  { %v945_v7 = vadd.f32 1.0, %v1577_v3 }
 0x4d9   :  { %1578 = vrcp.f32 %v945_v7  ;;  %v957_v31 = vand.u32 2147483648, %v945_v7  ;;  %v955_v42 = vand.u32 2147483647, %v945_v7  ;;  %vm951_vm15 = vweird.f32 %v945_v7 }
 0x4da   :  { %1580 = vtanh.f32 %v961_v17 }
 0x4db   :  { %v958_v51 = vor.u32 1.1754944e-38, %v957_v31  ;;  %vm956_vm1 = vcmp.eq.f32.partialorder %v955_v42, 8.507059e+37  ;;  %v1519_v31 = vld [vmem:[#allocation8 + $0x28] sm:$0xff] }
 0x4df   :  { %v1579_v13 = vpop.eup %1578 }
 0x4e0   :  { %v947_v14 = vmul.f32 %v1579_v13, %v945_v7  ;;  %vm952_vm14 = vweird.f32 %v1579_v13  ;;  %v1581_v30 = vpop.eup %1580 }
 0x4e1   :  { %vm953_vm0 = vmor %vm951_vm15, %vm952_vm14 }
 0x4e2   :  { %v948_v22 = vsub.f32 1.0, %v947_v14 }
 0x4e4   :  { %v949_v39 = vmul.f32 %v1579_v13, %v948_v22  ;;  %v1520_v22 = vld [vmem:[#allocation8 + $0x30] sm:$0xff] }
 0x4e6   :  { %v950_v46 = vadd.f32 %v1579_v13, %v949_v39 }
 0x4e8   :  { %v954_v55 = vsel %vm953_vm0, %v1579_v13, %v950_v46  ;;  %v1521_v13 = vld [vmem:[#allocation8 + $0x38] sm:$0xff] }
 0x4e9   :  { %v959_v60 = vsel %vm956_vm1, %v958_v51, %v954_v55 }
 0x4ea   :  { %v965_v1 = vrot.slane %v959_v60, 1  ;;  %v968_v8 = vmul.f32 %v1581_v30, %v959_v60  ;;  %v971_v15 = vrot.slane %v959_v60, 2  ;;  %v1518_v30 = vld [vmem:[#allocation8 + $0x20] sm:$0xff] }
 0x4ec   :  { %v967_v45 = vmul.f32 %v965_v1, %v2113_v58 }
 0x4ee   :  { %v969_v12 = vadd.f32 %v968_v8, %v967_v45 }
 0x4f0   :  { %1582 = vtanh.f32 %v969_v12 }
 0x4f6   :  { %v1583_v16 = vpop.eup %1582 }
 0x4f7   :  { %v973_v4 = vmul.f32 %v1583_v16, %v971_v15 }
 0x4f9   :  { %v976_v20 = vpack.c.bf16 %v973_v4, %v973_v4  ;;  %v1185_v21 = vperm.slane %v973_v4, 0  ;;  %v1517_v4 = vld [vmem:[#allocation8 + $0x18] sm:$0xff] }
 0x4fb   :  { %985 = vmatmul.bf16.vlgmr.msra.gmra.mxu0 %v976_v20  ;;  %998 = vmatmul.bf16.vlgmr.msra.gmra.mxu1 %v976_v20  ;;  %v1200_v24 = vsel %vm1199_vm5, %v2117_v6, %v1185_v21 }
 0x4fc   :  { %1011 = vmatmul.bf16.vlgmr.msrb.gmra.mxu2 %v976_v20  ;;  %1024 = vmatmul.bf16.vlgmr.msrb.gmra.mxu3 %v976_v20 }
 0x4fd   :  { %1274 = vmatpush.bf16.msra.mxu0 %v1521_v13 }
 0x501   :  { %1275 = vmatpush.bf16.msra.mxu0 %v1520_v22 }
 0x505   :  { %1276 = vmatpush.bf16.msra.mxu0 %v1519_v31 }
 0x509   :  { %1277 = vmatpush.bf16.msra.mxu0 %v1518_v30 }
 0x50d   :  { %1278 = vmatpush.bf16.msra.mxu0 %v1517_v4 }
 0x578   :  { %v986_v36 = vpop.f32.mrf.mxu0  ;;  %v999_v53 = vpop.f32.mrf.mxu1 }
 0x579   :  { %v1033_v59 = vrot.slane %v999_v53, 7  ;;  %v1516_v53 = vld [vmem:[#allocation8 + $0x10] sm:$0xff] }
 0x57a   :  { %1279 = vmatpush.bf16.msra.mxu0 %v1516_v53 }
 0x57b   :  { %v1036_v44 = vsel %vm439_vm3, %v986_v36, %v1033_v59  ;;  %v1515_v59 = vld [vmem:[#allocation8 + $0x8] sm:$0xff] }
 0x57e   :  { %1280 = vmatpush.bf16.msra.mxu0 %v1515_v59 }
 0x57f   :  { %v1012_v26 = vpop.f32.mrf.mxu2  ;;  %v1025_v27 = vpop.f32.mrf.mxu3 }
 0x580   :  { %v1034_v34 = vrot.slane %v1012_v26, 6  ;;  %v1035_v35 = vrot.slane %v1025_v27, 5  ;;  %v988_v40 = vpop.f32.mrf.mxu0  ;;  %v1001_v41 = vpop.f32.mrf.mxu1 }
 0x582   :  { %v1037_v9 = vsel %vm441_vm2, %v1034_v34, %v1035_v35  ;;  %v1514_v34 = vld [vmem:[#allocation8] sm:$0xff] }
 0x583   :  { %v1038_v49 = vsel %vm443_vm4, %v1036_v44, %v1037_v9  ;;  %1281 = vmatpush.bf16.msra.mxu0 %v1514_v34 }
 0x584   :  { %v1040_v50 = vadd.f32 %v1038_v49, %v975_v25 }
 0x586   :  { %v1041_v54 = vsub.f32 0.0, %v1040_v50  ;;  %v1060_v10 = vrot.slane %v1040_v50, 3 }
 0x587   :  { %v1014_v58 = vpop.f32.mrf.mxu2  ;;  %v1027_v62 = vpop.f32.mrf.mxu3 }
 0x588   :  { %v1042_v32 = vmul.f32 1.442695, %v1041_v54 }
 0x58a   :  { %1584 = vpow2.f32 %v1042_v32 }
 0x590   :  { %v1585_v63 = vpop.eup %1584 }
 0x591   :  { %v1044_v0 = vadd.f32 1.0, %v1585_v63 }
 0x593   :  { %1586 = vrcp.f32 %v1044_v0  ;;  %v1056_v18 = vand.u32 2147483648, %v1044_v0  ;;  %v1054_v23 = vand.u32 2147483647, %v1044_v0  ;;  %vm1050_vm7 = vweird.f32 %v1044_v0 }
 0x594   :  { %1588 = vtanh.f32 %v1060_v10 }
 0x595   :  { %v1057_v29 = vor.u32 1.1754944e-38, %v1056_v18  ;;  %vm1055_vm9 = vcmp.eq.f32.partialorder %v1054_v23, 8.507059e+37 }
 0x599   :  { %v1587_v5 = vpop.eup %1586 }
 0x59a   :  { %v1046_v6 = vmul.f32 %v1587_v5, %v1044_v0  ;;  %vm1051_vm6 = vweird.f32 %v1587_v5  ;;  %v1589_v43 = vpop.eup %1588 }
 0x59b   :  { %vm1052_vm8 = vmor %vm1050_vm7, %vm1051_vm6 }
 0x59c   :  { %v1047_v11 = vsub.f32 1.0, %v1046_v6 }
 0x59e   :  { %v1048_v19 = vmul.f32 %v1587_v5, %v1047_v11 }
 0x5a0   :  { %v1049_v28 = vadd.f32 %v1587_v5, %v1048_v19 }
 0x5a2   :  { %v1053_v33 = vsel %vm1052_vm8, %v1587_v5, %v1049_v28 }
 0x5a3   :  { %v1058_v37 = vsel %vm1055_vm9, %v1057_v29, %v1053_v33  ;;  %v1535_v29 = vld [vmem:[%s2180_s5] ss:$0 sm:$0xff]  ;;  %s1306_s5 = sshll.u32 %s2181_s6, 4  ;;  %s1307_s5 = int_to_ptr.hbm [resolvable:$true] %s1306_s5 }
 0x5a4   :  { %v1064_v38 = vrot.slane %v1058_v37, 1  ;;  %v1067_v48 = vmul.f32 %v1589_v43, %v1058_v37  ;;  %v1070_v56 = vrot.slane %v1058_v37, 2 }
 0x5a6   :  { %v1066_v47 = vmul.f32 %v1064_v38, %v969_v12  ;;  %v1074_v12 = vld [vmem:[#allocation2 + $0x7] ss:$8 sm:$0xf] }
 0x5a8   :  { %v2159_v52 = vadd.f32 %v1067_v48, %v1066_v47 }
 0x5aa   :  { %1590 = vtanh.f32 %v2159_v52 }
 0x5b0   :  { %v1591_v57 = vpop.eup %1590 }
 0x5b1   :  { %v1072_v61 = vmul.f32 %v1591_v57, %v1070_v56 }
 0x5b3   :  { %v1075_v2 = vpack.c.bf16 %v1072_v61, %v1072_v61  ;;  %v1188_v3 = vperm.slane %v1072_v61, 0 }
 0x5b5   :  { %1084 = vmatmul.bf16.vlgmr.msrb.gmra.mxu0 %v1075_v2  ;;  %1097 = vmatmul.bf16.vlgmr.msrb.gmra.mxu1 %v1075_v2  ;;  %v2162_v7 = vsel %vm1201_vm10, %v1200_v24, %v1188_v3 }
 0x5b6   :  { %1110 = vmatmul.bf16.vlgmr.msra.gmra.mxu2 %v1075_v2  ;;  %1123 = vmatmul.bf16.vlgmr.msra.gmra.mxu3 %v1075_v2 }
 0x632   :  { %v1085_v14 = vpop.f32.mrf.mxu0  ;;  %v1098_v17 = vpop.f32.mrf.mxu1 }
 0x633   :  { %v1132_v39 = vrot.slane %v1098_v17, 7 }
 0x635   :  { %v1135_v45 = vsel %vm439_vm3, %v1085_v14, %v1132_v39 }
 0x639   :  { %v1111_v42 = vpop.f32.mrf.mxu2  ;;  %v1124_v46 = vpop.f32.mrf.mxu3 }
 0x63a   :  { %v1133_v51 = vrot.slane %v1111_v42, 6  ;;  %v1134_v55 = vrot.slane %v1124_v46, 5  ;;  %v1087_v60 = vpop.f32.mrf.mxu0  ;;  %v1100_v1 = vpop.f32.mrf.mxu1 }
 0x63c   :  { %v1136_v8 = vsel %vm441_vm2, %v1133_v51, %v1134_v55 }
 0x63d   :  { %v1137_v15 = vsel %vm443_vm4, %v1135_v45, %v1136_v8 }
 0x63e   :  { %v1139_v16 = vadd.f32 %v1137_v15, %v1074_v12 }
 0x640   :  { %v1140_v20 = vsub.f32 0.0, %v1139_v16  ;;  %v1159_v41 = vrot.slane %v1139_v16, 3 }
 0x641   :  { %v1113_v21 = vpop.f32.mrf.mxu2  ;;  %v1126_v24 = vpop.f32.mrf.mxu3 }
 0x642   :  { %v1141_v36 = vmul.f32 1.442695, %v1140_v20 }
 0x644   :  { %1592 = vpow2.f32 %v1141_v36 }
 0x64a   :  { %v1593_v26 = vpop.eup %1592 }
 0x64b   :  { %v1143_v27 = vadd.f32 1.0, %v1593_v26 }
 0x64d   :  { %1594 = vrcp.f32 %v1143_v27  ;;  %v1155_v9 = vand.u32 2147483648, %v1143_v27  ;;  %v1153_v49 = vand.u32 2147483647, %v1143_v27  ;;  %vm1149_vm3 = vweird.f32 %v1143_v27 }
 0x64e   :  { %1596 = vtanh.f32 %v1159_v41 }
 0x64f   :  { %v1156_v54 = vor.u32 1.1754944e-38, %v1155_v9  ;;  %vm1154_vm11 = vcmp.eq.f32.partialorder %v1153_v49, 8.507059e+37 }
 0x653   :  { %v1595_v35 = vpop.eup %1594 }
 0x654   :  { %v1145_v40 = vmul.f32 %v1595_v35, %v1143_v27  ;;  %vm1150_vm2 = vweird.f32 %v1595_v35  ;;  %v1597_v63 = vpop.eup %1596 }
 0x655   :  { %vm1151_vm4 = vmor %vm1149_vm3, %vm1150_vm2 }
 0x656   :  { %v1146_v44 = vsub.f32 1.0, %v1145_v40 }
 0x658   :  { %v1147_v25 = vmul.f32 %v1595_v35, %v1146_v44 }
 0x65a   :  { %v1148_v50 = vadd.f32 %v1595_v35, %v1147_v25 }
 0x65c   :  { %v1152_v58 = vsel %vm1151_vm4, %v1595_v35, %v1148_v50 }
 0x65d   :  { %v1157_v62 = vsel %vm1154_vm11, %v1156_v54, %v1152_v58 }
 0x65e   :  { %v1163_v32 = vrot.slane %v1157_v62, 1  ;;  %v1166_v5 = vmul.f32 %v1597_v63, %v1157_v62  ;;  %v1169_v10 = vrot.slane %v1157_v62, 2 }
 0x660   :  { %v1165_v0 = vmul.f32 %v1163_v32, %v2159_v52 }
 0x662   :  { %v1167_v6 = vadd.f32 %v1166_v5, %v1165_v0 }
 0x664   :  { %1598 = vtanh.f32 %v1167_v6 }
 0x66a   :  { %v1599_v11 = vpop.eup %1598 }
 0x66b   :  { %v1171_v18 = vmul.f32 %v1599_v11, %v1169_v10 }
 0x66d   :  { %v1191_v19 = vperm.slane %v1171_v18, 0 }
 0x66f   :  { %v1204_v23 = vsel %vm1203_vm12, %v2162_v7, %v1191_v19 }
 0x670   :  { %v1205_v28 = vpack.c.bf16 %v1204_v23, %v1204_v23 }
 0x672   :  { %1282 = vmatmul.bf16.vlgmr.msra.gmra.mxu0 %v1205_v28 }
 0x6ef   :  { %v1283_v33 = vpop.f32.mrf.mxu0 }
 0x6f0   :  { %v1284_v37 = vadd.f32 %v1535_v29, %v1283_v33 }
 0x6f2   :  { %1287 = vmax.xlane.f32.xlu0 %v1284_v37 }
 0x6f7   :  { %v1285_v38 = vpop.f32.mrf.mxu0 }
 0x765   :  { %v1288_v43 = vpop.xlane.xlu0 %1287 }
 0x766   :  { %v1289_v47 = vsub.f32 %v1284_v37, %v1288_v43 }
 0x768   :  { %v1290_v48 = vmul.f32 1.442695, %v1289_v47 }
 0x76a   :  { %1600 = vpow2.f32 %v1290_v48 }
 0x770   :  { %v1601_v52 = vpop.eup %1600 }
 0x771   :  { %1292 = vadd.xlane.f32.xlu1 %v1601_v52 }
 0x7e4   :  { %v1293_v56 = vpop.xlane.xlu1 %1292 }
 0x7e5   :  { %1602 = vlog2.f32 %v1293_v56 }
 0x7eb   :  { %v1603_v57 = vpop.eup %1602 }
 0x7ec   :  { %v1295_v61 = vmul.f32 0.6931472, %v1603_v57 }
 0x7ee   :  { %v1296_v2 = vadd.f32 %v1295_v61, %v1288_v43 }
 0x7f0   :  { %v1297_v3 = vsub.f32 %v1284_v37, %v1296_v2 }
 0x7f2   :  { %1298 = vst [vmem:[#allocation9] sm:$0xff] %v1297_v3 }
 0x7f3   :  { %1309 = dma.vmem_to_hbm [thread:$0]  %s1305_s20, 128, %s1307_s5, [#allocation5]  }
 0x7f4   :  { %1704 = dma.done.wait [#allocation5], 128  }
 0x7f5   :  { %1705 = vsyncadd [#allocation5], 4294967168 }
 0x7f6   :  { %1314 = vsyncpa [#allocation4], 1 }
 0x7f7   :  { %1315 = vsyncpa [#allocation7], 1 }
 0x7f8   :  { %1316 = vsyncpa [#allocation5], 1 }

</bundles_post_ra>
